<compile_context>
chip_gen: v6e
topology: v6e:2x2x1
jax: 0.10.0
libtpu: 0.0.40
codegen_flags: <defaults>
</compile_context>

<pallas_src>
import functools

import jax
import jax.numpy as jnp
import numpy as np
from jax.experimental import pallas as pl
from jax.experimental.pallas import tpu as pltpu

_OFFSETS = tuple((dy, dx) for dy in (-1, 0, 1) for dx in (-1, 0, 1))


def _dilated_attention_kernel(mask_ref, qk_ref, c_ref, out_ref, *, W, Cq):
    # mask_ref: (9, HWp)        0/1 validity of the 9 offsets (grid-invariant)
    # qk_ref:   (nb, 2*Cq, HWp) queries (rows 0:Cq) || keys (rows Cq:2Cq)
    # c_ref:    (nb, Cv, HWp)   values
    # out_ref:  (nb, Cv, HWp)
    Nb = qk_ref.shape[0]
    Cv = c_ref.shape[1]
    HWp = qk_ref.shape[-1]

    maskf = mask_ref[...]                                   # (9, HWp) f32 0/1

    def neighbour(x, oy, ox):
        # x[..., i*W + j] -> x[..., (i+oy)*W + (j+ox)] via one XLU lane
        # rotation; wrapped lanes are exactly the masked (OOB) ones.
        s = oy * W + ox
        if s == 0:
            return x
        return pltpu.roll(x, (-s) % HWp, 1)

    def process(n):
        qk = qk_ref[n].astype(jnp.float32)                  # (2*Cq, HWp)
        a = qk[:Cq]
        b = qk[Cq:]
        v = c_ref[n]                                        # (Cv, HWp) native dtype

        # ---- da_weight: 9 channel-reduced correlations, packed sublane-dense.
        e_rows = [jnp.sum(a * neighbour(b, oy, ox), axis=0, keepdims=True)
                  for oy, ox in _OFFSETS]
        # OOB energies forced to 0 (zero-padding semantics, NOT -inf); they
        # still count in the softmax denominator, matching the CUDA op.
        energy = jnp.concatenate(e_rows, axis=0) * maskf    # (9, HWp)

        # ---- softmax over the 9 offsets, on the dense slab.
        m = jnp.max(energy, axis=0, keepdims=True)          # (1, HWp)
        p = jnp.exp(energy - m)                             # one dense EUP pass
        l = jnp.sum(p, axis=0, keepdims=True)               # incl. OOB rows
        p = p * maskf                                       # zero OOB weights

        # ---- da_map: weighted sum of shifted values.  Multiply in the value's
        # native dtype (bf16 stays bf16 on v6e/v7x VALU); accumulate in f32.
        # TODO(synk): if XLU saturates for small Cv, switch this roll-based
        # path to a zero-padded halo slab in VMEM scratch read with lane slices.
        acc = jnp.zeros((Cv, HWp), jnp.float32)
        for k, (oy, ox) in enumerate(_OFFSETS):
            pk = p[k:k + 1, :].astype(v.dtype)
            acc = acc + (pk * neighbour(v, oy, ox)).astype(jnp.float32)

        # Normalize once at the end; approximate reciprocal rides the EUP slot
        # (use approx=False if bit-parity with the CUDA op is required).
        inv_l = pl.reciprocal(l, approx=True)
        out_ref[n] = (acc * inv_l).astype(out_ref.dtype)

    if Nb == 1:
        process(0)
    else:
        # Bound per-iteration live ranges instead of statically unrolling.
        @pl.loop(0, Nb)
        def _(n):
            process(n)


def _build_offset_mask(H, W, HWp):
    """Static (9, HWp) 0/1 validity mask for the 9 neighbour offsets."""
    pos = np.arange(HWp)
    row = pos // W
    col = pos % W
    rows = []
    for oy, ox in _OFFSETS:
        valid = ((row + oy >= 0) & (row + oy < H) &
                 (col + ox >= 0) & (col + ox < W) & (pos < H * W))
        rows.append(valid)
    return jnp.asarray(np.stack(rows).astype(np.float32))


def _vmem_capacity_bytes():
    """Per-core VMEM capacity; generation-aware (v7x: 64 MiB, v5e/v6e: 128)."""
    try:
        cap = int(getattr(pltpu.get_tpu_info(), "vmem_capacity_bytes", 0) or 0)
        if cap > 0:
            return cap
    except Exception:
        pass
    return 128 << 20


def _pick_batch_tile(N, per_batch_bytes, vmem_budget, min_steps):
    """Largest divisor nb of N keeping >= min_steps grid steps and fitting VMEM."""
    nb = 1
    for cand in range(2, N + 1):
        if N % cand:
            continue
        if N // cand < min_steps or cand * per_batch_bytes > vmem_budget:
            break
        nb = cand
    return nb


def dilated_attention(a, b, c):
    """a, b: (N, Cq, H, W); c: (N, Cv, H, W) -> (N, Cv, H, W)."""
    N, Cq, H, W = a.shape
    Cv = c.shape[1]
    HW = H * W
    # Lane-dense flattened spatial extent (multiple of 128) -> unmasked stores.
    HWp = max(128, ((HW + 127) // 128) * 128)

    # q/k concatenated along channels -> one sublane-dense (2*Cq)-row block.
    qk = jnp.concatenate([a, b], axis=1).reshape(N, 2 * Cq, HW)
    c2 = c.reshape(N, Cv, HW)
    if HWp != HW:
        qk = jnp.pad(qk, ((0, 0), (0, 0), (0, HWp - HW)))
        c2 = jnp.pad(c2, ((0, 0), (0, 0), (0, HWp - HW)))
    maskf = _build_offset_mask(H, W, HWp)

    qk_item = jnp.dtype(qk.dtype).itemsize
    v_item = jnp.dtype(c2.dtype).itemsize
    # Double-buffered I/O blocks per batch element ...
    io_per_batch = 2 * (2 * Cq * qk_item + 2 * Cv * v_item) * HWp
    # ... plus the f32 in-kernel temporaries (independent of nb thanks to the
    # bounded-live-range batch loop) and the resident mask slab.
    temporaries = (2 * Cq + 2 * Cv + 3 * 9 + 8) * HWp * 4 + 2 * 9 * HWp * 4

    cap = _vmem_capacity_bytes()
    budget = cap // 2 - temporaries
    min_steps = min(N, 8) if N > 1 else 1      # >= 2 steps feeds both v7x TCs
    nb = _pick_batch_tile(N, io_per_batch, budget, min_steps)
    grid = (N // nb,)

    need = nb * io_per_batch + temporaries
    vmem_limit = int(min(cap // 2, need + (4 << 20))) if need > (12 << 20) else None

    kernel = functools.partial(_dilated_attention_kernel, W=W, Cq=Cq)

    flops = N * HW * (18 * Cq + 18 * Cv + 40)
    bytes_accessed = (qk.size * qk_item + c2.size * v_item +
                      N * Cv * HWp * v_item + maskf.size * 4)

    out = pl.pallas_call(
        kernel,
        out_shape=jax.ShapeDtypeStruct((N, Cv, HWp), c.dtype),
        grid=grid,
        in_specs=[
            pl.BlockSpec((9, HWp), lambda n: (0, 0)),          # mask (resident)
            pl.BlockSpec((nb, 2 * Cq, HWp), lambda n: (n, 0, 0)),
            pl.BlockSpec((nb, Cv, HWp), lambda n: (n, 0, 0)),
        ],
        out_specs=pl.BlockSpec((nb, Cv, HWp), lambda n: (n, 0, 0)),
        compiler_params=pltpu.CompilerParams(
            dimension_semantics=("parallel",),
            vmem_limit_bytes=vmem_limit),
        cost_estimate=pl.CostEstimate(
            flops=int(flops),
            transcendentals=int(N * 10 * HW),
            bytes_accessed=int(bytes_accessed)),
    )(maskf, qk, c2)
    # TODO(synk): for very large Cv*H*W (v7x's 64 MiB VMEM) add an H-tiling grid
    # axis with a one-row halo instead of whole-image blocks.
    if HWp != HW:
        out = out[:, :, :HW]
    return out.reshape(N, Cv, H, W)


def _reference(a, b, c):
    """Pure-JAX reference with identical semantics (for verification)."""
    N, Cq, H, W = a.shape
    bpad = jnp.pad(b, ((0, 0), (0, 0), (1, 1), (1, 1)))
    cpad = jnp.pad(c, ((0, 0), (0, 0), (1, 1), (1, 1)))
    es = []
    for k in range(9):
        dy, dx = k // 3, k % 3
        es.append(jnp.sum(a * bpad[:, :, dy:dy + H, dx:dx + W], axis=1))
    energy = jnp.stack(es, axis=1)                     # (N, 9, H, W)
    att = jax.nn.softmax(energy, axis=1)
    out = jnp.zeros_like(c)
    for k in range(9):
        dy, dx = k // 3, k % 3
        out = out + att[:, k:k + 1] * cpad[:, :, dy:dy + H, dx:dx + W]
    return out


if __name__ == "__main__":
    key = jax.random.PRNGKey(0)

    in_dim = 32                  # DilatedAttention(in_dim=32)
    N, H, W = 2, 16, 16
    Cq = in_dim // 8             # query/key channels implied by the 1x1 convs

    # Note: the query/key/value 1x1 convs declared in __init__ are never applied
    # in the module's forward(a, b, c); a, b, c are consumed directly.

    ka, kb, kc = jax.random.split(key, 3)
    a = jax.random.normal(ka, (N, Cq, H, W), jnp.float32)
    b = jax.random.normal(kb, (N, Cq, H, W), jnp.float32)
    c = jax.random.normal(kc, (N, in_dim, H, W), jnp.float32)

    out = jax.block_until_ready(dilated_attention(a, b, c))
    ref = jax.block_until_ready(_reference(a, b, c))

    assert out.shape == (N, in_dim, H, W)
    # Tolerance relaxed slightly for the approximate (EUP) reciprocal.
    np.testing.assert_allclose(np.asarray(out), np.asarray(ref),
                               rtol=5e-3, atol=5e-3)
    print("KERNEL_OK")
</pallas_src>

<mosaic_0001>
module attributes {stable_mosaic.version = 11 : i64} {
  func.func @_dilated_attention_kernel(%arg0: i32, %arg1: memref<9x256xf32, #tpu.memory_space<vmem>>, %arg2: memref<1x8x256xf32, #tpu.memory_space<vmem>>, %arg3: memref<1x32x256xf32, #tpu.memory_space<vmem>>, %arg4: memref<1x32x256xf32, #tpu.memory_space<vmem>>) attributes {dimension_semantics = [#tpu.dimension_semantics<parallel>], iteration_bounds = array<i64: 2>, scalar_prefetch = 0 : i64, scratch_operands = 0 : i64, tpu.core_type = #tpu.core_type<tc>, window_params = [{pipeline_mode = #tpu.pipeline_mode<synchronous>, transform_indices = @transform_0, window_bounds = array<i64: 9, 256>}, {transform_indices = @transform_1, window_bounds = array<i64: 1, 8, 256>}, {transform_indices = @transform_2, window_bounds = array<i64: 1, 32, 256>}, {transform_indices = @transform_3, window_bounds = array<i64: 1, 32, 256>}]} {
    %c0 = arith.constant 0 : index
    %c0_0 = arith.constant 0 : index
    %0 = vector.load %arg1[%c0, %c0_0] : memref<9x256xf32, #tpu.memory_space<vmem>>, vector<9x256xf32>
    %c0_1 = arith.constant 0 : index
    %c0_2 = arith.constant 0 : index
    %c0_3 = arith.constant 0 : index
    %1 = vector.load %arg2[%c0_1, %c0_2, %c0_3] : memref<1x8x256xf32, #tpu.memory_space<vmem>>, vector<1x8x256xf32>
    %2 = vector.shape_cast %1 : vector<1x8x256xf32> to vector<8x256xf32>
    %3 = vector.extract_strided_slice %2 {offsets = [0, 0], sizes = [4, 256], strides = [1, 1]} : vector<8x256xf32> to vector<4x256xf32>
    %4 = vector.extract_strided_slice %2 {offsets = [4, 0], sizes = [4, 256], strides = [1, 1]} : vector<8x256xf32> to vector<4x256xf32>
    %c0_4 = arith.constant 0 : index
    %c0_5 = arith.constant 0 : index
    %c0_6 = arith.constant 0 : index
    %5 = vector.load %arg3[%c0_4, %c0_5, %c0_6] : memref<1x32x256xf32, #tpu.memory_space<vmem>>, vector<1x32x256xf32>
    %6 = vector.shape_cast %5 : vector<1x32x256xf32> to vector<32x256xf32>
    %c17_i32 = arith.constant 17 : i32
    %7 = tpu.dynamic_rotate %4 by %c17_i32 dim 1 : vector<4x256xf32>, i32 -> vector<4x256xf32>
    %8 = arith.mulf %3, %7 : vector<4x256xf32>
    %cst = arith.constant dense<0.000000e+00> : vector<256xf32>
    %9 = vector.multi_reduction <add>, %8, %cst [0] : vector<4x256xf32> to vector<256xf32>
    %10 = vector.shape_cast %9 : vector<256xf32> to vector<1x256xf32>
    %c16_i32 = arith.constant 16 : i32
    %11 = tpu.dynamic_rotate %4 by %c16_i32 dim 1 : vector<4x256xf32>, i32 -> vector<4x256xf32>
    %12 = arith.mulf %3, %11 : vector<4x256xf32>
    %cst_7 = arith.constant dense<0.000000e+00> : vector<256xf32>
    %13 = vector.multi_reduction <add>, %12, %cst_7 [0] : vector<4x256xf32> to vector<256xf32>
    %14 = vector.shape_cast %13 : vector<256xf32> to vector<1x256xf32>
    %c15_i32 = arith.constant 15 : i32
    %15 = tpu.dynamic_rotate %4 by %c15_i32 dim 1 : vector<4x256xf32>, i32 -> vector<4x256xf32>
    %16 = arith.mulf %3, %15 : vector<4x256xf32>
    %cst_8 = arith.constant dense<0.000000e+00> : vector<256xf32>
    %17 = vector.multi_reduction <add>, %16, %cst_8 [0] : vector<4x256xf32> to vector<256xf32>
    %18 = vector.shape_cast %17 : vector<256xf32> to vector<1x256xf32>
    %c1_i32 = arith.constant 1 : i32
    %19 = tpu.dynamic_rotate %4 by %c1_i32 dim 1 : vector<4x256xf32>, i32 -> vector<4x256xf32>
    %20 = arith.mulf %3, %19 : vector<4x256xf32>
    %cst_9 = arith.constant dense<0.000000e+00> : vector<256xf32>
    %21 = vector.multi_reduction <add>, %20, %cst_9 [0] : vector<4x256xf32> to vector<256xf32>
    %22 = vector.shape_cast %21 : vector<256xf32> to vector<1x256xf32>
    %23 = arith.mulf %3, %4 : vector<4x256xf32>
    %cst_10 = arith.constant dense<0.000000e+00> : vector<256xf32>
    %24 = vector.multi_reduction <add>, %23, %cst_10 [0] : vector<4x256xf32> to vector<256xf32>
    %25 = vector.shape_cast %24 : vector<256xf32> to vector<1x256xf32>
    %c255_i32 = arith.constant 255 : i32
    %26 = tpu.dynamic_rotate %4 by %c255_i32 dim 1 : vector<4x256xf32>, i32 -> vector<4x256xf32>
    %27 = arith.mulf %3, %26 : vector<4x256xf32>
    %cst_11 = arith.constant dense<0.000000e+00> : vector<256xf32>
    %28 = vector.multi_reduction <add>, %27, %cst_11 [0] : vector<4x256xf32> to vector<256xf32>
    %29 = vector.shape_cast %28 : vector<256xf32> to vector<1x256xf32>
    %c241_i32 = arith.constant 241 : i32
    %30 = tpu.dynamic_rotate %4 by %c241_i32 dim 1 : vector<4x256xf32>, i32 -> vector<4x256xf32>
    %31 = arith.mulf %3, %30 : vector<4x256xf32>
    %cst_12 = arith.constant dense<0.000000e+00> : vector<256xf32>
    %32 = vector.multi_reduction <add>, %31, %cst_12 [0] : vector<4x256xf32> to vector<256xf32>
    %33 = vector.shape_cast %32 : vector<256xf32> to vector<1x256xf32>
    %c240_i32 = arith.constant 240 : i32
    %34 = tpu.dynamic_rotate %4 by %c240_i32 dim 1 : vector<4x256xf32>, i32 -> vector<4x256xf32>
    %35 = arith.mulf %3, %34 : vector<4x256xf32>
    %cst_13 = arith.constant dense<0.000000e+00> : vector<256xf32>
    %36 = vector.multi_reduction <add>, %35, %cst_13 [0] : vector<4x256xf32> to vector<256xf32>
    %37 = vector.shape_cast %36 : vector<256xf32> to vector<1x256xf32>
    %c239_i32 = arith.constant 239 : i32
    %38 = tpu.dynamic_rotate %4 by %c239_i32 dim 1 : vector<4x256xf32>, i32 -> vector<4x256xf32>
    %39 = arith.mulf %3, %38 : vector<4x256xf32>
    %cst_14 = arith.constant dense<0.000000e+00> : vector<256xf32>
    %40 = vector.multi_reduction <add>, %39, %cst_14 [0] : vector<4x256xf32> to vector<256xf32>
    %41 = vector.shape_cast %40 : vector<256xf32> to vector<1x256xf32>
    %42 = tpu.concatenate %10, %14, %18, %22, %25, %29, %33, %37, %41 in 0 : vector<1x256xf32>, vector<1x256xf32>, vector<1x256xf32>, vector<1x256xf32>, vector<1x256xf32>, vector<1x256xf32>, vector<1x256xf32>, vector<1x256xf32>, vector<1x256xf32> -> vector<9x256xf32>
    %43 = arith.mulf %42, %0 : vector<9x256xf32>
    %cst_15 = arith.constant dense<0xFF800000> : vector<256xf32>
    %44 = vector.multi_reduction <maximumf>, %43, %cst_15 [0] : vector<9x256xf32> to vector<256xf32>
    %45 = vector.shape_cast %44 : vector<256xf32> to vector<1x256xf32>
    %46 = vector.broadcast %45 : vector<1x256xf32> to vector<9x256xf32>
    %47 = arith.subf %43, %46 : vector<9x256xf32>
    %48 = math.exp %47 : vector<9x256xf32>
    %cst_16 = arith.constant dense<0.000000e+00> : vector<256xf32>
    %49 = vector.multi_reduction <add>, %48, %cst_16 [0] : vector<9x256xf32> to vector<256xf32>
    %50 = vector.shape_cast %49 : vector<256xf32> to vector<1x256xf32>
    %51 = arith.mulf %48, %0 : vector<9x256xf32>
    %cst_17 = arith.constant 0.000000e+00 : f32
    %52 = vector.broadcast %cst_17 : f32 to vector<32x256xf32>
    %53 = vector.extract_strided_slice %51 {offsets = [0, 0], sizes = [1, 256], strides = [1, 1]} : vector<9x256xf32> to vector<1x256xf32>
    %c17_i32_18 = arith.constant 17 : i32
    %54 = tpu.dynamic_rotate %6 by %c17_i32_18 dim 1 : vector<32x256xf32>, i32 -> vector<32x256xf32>
    %55 = vector.broadcast %53 : vector<1x256xf32> to vector<32x256xf32>
    %56 = arith.mulf %55, %54 : vector<32x256xf32>
    %57 = arith.addf %52, %56 : vector<32x256xf32>
    %58 = vector.extract_strided_slice %51 {offsets = [1, 0], sizes = [1, 256], strides = [1, 1]} : vector<9x256xf32> to vector<1x256xf32>
    %c16_i32_19 = arith.constant 16 : i32
    %59 = tpu.dynamic_rotate %6 by %c16_i32_19 dim 1 : vector<32x256xf32>, i32 -> vector<32x256xf32>
    %60 = vector.broadcast %58 : vector<1x256xf32> to vector<32x256xf32>
    %61 = arith.mulf %60, %59 : vector<32x256xf32>
    %62 = arith.addf %57, %61 : vector<32x256xf32>
    %63 = vector.extract_strided_slice %51 {offsets = [2, 0], sizes = [1, 256], strides = [1, 1]} : vector<9x256xf32> to vector<1x256xf32>
    %c15_i32_20 = arith.constant 15 : i32
    %64 = tpu.dynamic_rotate %6 by %c15_i32_20 dim 1 : vector<32x256xf32>, i32 -> vector<32x256xf32>
    %65 = vector.broadcast %63 : vector<1x256xf32> to vector<32x256xf32>
    %66 = arith.mulf %65, %64 : vector<32x256xf32>
    %67 = arith.addf %62, %66 : vector<32x256xf32>
    %68 = vector.extract_strided_slice %51 {offsets = [3, 0], sizes = [1, 256], strides = [1, 1]} : vector<9x256xf32> to vector<1x256xf32>
    %c1_i32_21 = arith.constant 1 : i32
    %69 = tpu.dynamic_rotate %6 by %c1_i32_21 dim 1 : vector<32x256xf32>, i32 -> vector<32x256xf32>
    %70 = vector.broadcast %68 : vector<1x256xf32> to vector<32x256xf32>
    %71 = arith.mulf %70, %69 : vector<32x256xf32>
    %72 = arith.addf %67, %71 : vector<32x256xf32>
    %73 = vector.extract_strided_slice %51 {offsets = [4, 0], sizes = [1, 256], strides = [1, 1]} : vector<9x256xf32> to vector<1x256xf32>
    %74 = vector.broadcast %73 : vector<1x256xf32> to vector<32x256xf32>
    %75 = arith.mulf %74, %6 : vector<32x256xf32>
    %76 = arith.addf %72, %75 : vector<32x256xf32>
    %77 = vector.extract_strided_slice %51 {offsets = [5, 0], sizes = [1, 256], strides = [1, 1]} : vector<9x256xf32> to vector<1x256xf32>
    %c255_i32_22 = arith.constant 255 : i32
    %78 = tpu.dynamic_rotate %6 by %c255_i32_22 dim 1 : vector<32x256xf32>, i32 -> vector<32x256xf32>
    %79 = vector.broadcast %77 : vector<1x256xf32> to vector<32x256xf32>
    %80 = arith.mulf %79, %78 : vector<32x256xf32>
    %81 = arith.addf %76, %80 : vector<32x256xf32>
    %82 = vector.extract_strided_slice %51 {offsets = [6, 0], sizes = [1, 256], strides = [1, 1]} : vector<9x256xf32> to vector<1x256xf32>
    %c241_i32_23 = arith.constant 241 : i32
    %83 = tpu.dynamic_rotate %6 by %c241_i32_23 dim 1 : vector<32x256xf32>, i32 -> vector<32x256xf32>
    %84 = vector.broadcast %82 : vector<1x256xf32> to vector<32x256xf32>
    %85 = arith.mulf %84, %83 : vector<32x256xf32>
    %86 = arith.addf %81, %85 : vector<32x256xf32>
    %87 = vector.extract_strided_slice %51 {offsets = [7, 0], sizes = [1, 256], strides = [1, 1]} : vector<9x256xf32> to vector<1x256xf32>
    %c240_i32_24 = arith.constant 240 : i32
    %88 = tpu.dynamic_rotate %6 by %c240_i32_24 dim 1 : vector<32x256xf32>, i32 -> vector<32x256xf32>
    %89 = vector.broadcast %87 : vector<1x256xf32> to vector<32x256xf32>
    %90 = arith.mulf %89, %88 : vector<32x256xf32>
    %91 = arith.addf %86, %90 : vector<32x256xf32>
    %92 = vector.extract_strided_slice %51 {offsets = [8, 0], sizes = [1, 256], strides = [1, 1]} : vector<9x256xf32> to vector<1x256xf32>
    %c239_i32_25 = arith.constant 239 : i32
    %93 = tpu.dynamic_rotate %6 by %c239_i32_25 dim 1 : vector<32x256xf32>, i32 -> vector<32x256xf32>
    %94 = vector.broadcast %92 : vector<1x256xf32> to vector<32x256xf32>
    %95 = arith.mulf %94, %93 : vector<32x256xf32>
    %96 = arith.addf %91, %95 : vector<32x256xf32>
    %97 = tpu.reciprocal %50 {approx = true} : vector<1x256xf32> -> vector<1x256xf32>
    %98 = vector.broadcast %97 : vector<1x256xf32> to vector<32x256xf32>
    %99 = arith.mulf %96, %98 : vector<32x256xf32>
    %c0_26 = arith.constant 0 : index
    %c0_27 = arith.constant 0 : index
    %c0_28 = arith.constant 0 : index
    %100 = vector.load %arg4[%c0_26, %c0_27, %c0_28] : memref<1x32x256xf32, #tpu.memory_space<vmem>>, vector<1x32x256xf32>
    %101 = vector.shape_cast %100 : vector<1x32x256xf32> to vector<32x256xf32>
    %102 = vector.shape_cast %99 : vector<32x256xf32> to vector<1x32x256xf32>
    tpu.vector_store %arg4[%c0_26, %c0_27, %c0_28], %102 {strides = array<i32>} : memref<1x32x256xf32, #tpu.memory_space<vmem>>, vector<1x32x256xf32>,
    return
  }
  func.func @transform_0(%arg0: i32) -> (i32, i32) {
    %c0_i32 = arith.constant 0 : i32
    %c0_i32_0 = arith.constant 0 : i32
    %c0_i32_1 = arith.constant 0 : i32
    return %c0_i32, %c0_i32_0 : i32, i32
  }
  func.func @transform_1(%arg0: i32) -> (i32, i32, i32) {
    %c0_i32 = arith.constant 0 : i32
    %c0_i32_0 = arith.constant 0 : i32
    %c0_i32_1 = arith.constant 0 : i32
    return %arg0, %c0_i32, %c0_i32_0 : i32, i32, i32
  }
  func.func @transform_2(%arg0: i32) -> (i32, i32, i32) {
    %c0_i32 = arith.constant 0 : i32
    %c0_i32_0 = arith.constant 0 : i32
    %c0_i32_1 = arith.constant 0 : i32
    return %arg0, %c0_i32, %c0_i32_0 : i32, i32, i32
  }
  func.func @transform_3(%arg0: i32) -> (i32, i32, i32) {
    %c0_i32 = arith.constant 0 : i32
    %c0_i32_0 = arith.constant 0 : i32
    %c0_i32_1 = arith.constant 0 : i32
    return %arg0, %c0_i32, %c0_i32_0 : i32, i32, i32
  }
}

</mosaic_0001>

<bundles_post_ra>
// kernel: tpu_custom_call.1
= control target key start
LH: loop header
LB: loop body
LE: loop exit
PB: predicated region body
PF: predicated region fallthrough
CT: control target
= control target key end

     0   :  { %8 = vsyncpa [#allocation3], 0  ;;  %s2236_s0 = inlined_call_operand.hbm [shape: f32[9,256], index: 0, kind: input, shape index: {}]   ;;  %s2237_s1 = inlined_call_operand.hbm [shape: f32[2,8,256], index: 1, kind: input, shape index: {}]   ;;  %s2238_s2 = inlined_call_operand.hbm [shape: f32[2,32,256], index: 2, kind: input, shape index: {}]   ;;  %s2239_s3 = inlined_call_operand.hbm [shape: f32[2,32,256], index: 3, kind: output, shape index: {}]  }
   0x1   :  { %9 = vsyncpa [#allocation6], 0 }
   0x2   :  { %11 = vsyncpa [#allocation6 + $0x1], 0 }
   0x3   :  { %12 = vsyncpa [#allocation4], 0 }
   0x4   :  { %14 = vsyncpa [#allocation4 + $0x1], 0  ;;  %s1374_s12 = smov 0   ;;  %s1376_s13 = smov 0  }
   0x5   :  { %s1378_s14 = smov 0   ;;  %s1380_s15 = smov 0  }
   0x6 LB: > { %s1395_s16 = sadd.s32 1, %s1337_s15   ;;  %s48_s17 = sadd.s32 1, %s1333_s14  ;;  %s1337_s15 = sphi %s1380_s15, %s2293_s15   ;;  %s1333_s14 = sphi %s1378_s14, %s2292_s14   ;;  %s1329_s13 = sphi %s1376_s13, %s2291_s13   ;;  %s1325_s12 = sphi %s1374_s12, %s2290_s12  }
   0x7   : > { %s45_s18 = ssub.s32 %s1337_s15, %s1395_s16  ;;  %p2240_p0 = scmp.ne.s32.totalorder %s1333_s14, %s1329_s13 }
   0x8   : > { %p46_p1 = scmp.eq.s32.totalorder %s45_s18, 0  ;;  %p56_p2 = scmp.eq.s32.totalorder %s1337_s15, 0 }
   0x9   : > { %p1128_p4 = scmp.lt.s32.totalorder %s1337_s15, 2  ;;  %s150_s20 = sand.u32 1, %s1337_s15  }
   0xa   : > { %s1406_s19 = scalar_select %p46_p1, %s1333_s14, %s48_s17  }
   0xb   : > { %p57_p5 = por %p56_p2, %p2240_p0  ;;  %s152_s21 = sand.u32 1, %s1333_s14  }
   0xc   : > { %s1083_s22 = sshll.u32 %s152_s21, 4  ;;  %s1099_s23 = sshll.u32 %s1337_s15, 8 }
   0xd   : > { %s1417_s26 = scalar_lea.hbm %s2237_s1, %s1099_s23  ;;  %s154_s27 = scalar_lea.vmem [#allocation5], %s1083_s22 }
   0xe   : > { %s162_s28 = sshll.u32 %s154_s27, 4  ;;  %p1419_p6 = pnand %p1128_p4, %p57_p5  ;;  %s163_s28 = int_to_ptr.vmem [resolvable:$true] %s162_s28 }
   0xf   : > { %s1086_s30 = sshll.u32 %s152_s21, 6  ;;  %s1423_s4 = scalar_lea.sflag [#allocation6], %s150_s20 }
  0x10   : > { %s1187_s5 = scalar_lea.hbm %s1417_s26, 256  ;;  %p1189_p8 = pneg %p1419_p6 }
  0x11   : > { %p1188_p7 = scmp.ne.s32.totalorder %s1417_s26, %s1187_s5  ;;  %s1192_s8 = scalar_lea.hbm %s2237_s1, 512 }
  0x12   : > { %p1193_p11 = scmp.lt.s32.totalorder %s1417_s26, %s2237_s1  ;;  %p1194_p12 = scmp.lt.s32.totalorder %s1192_s8, %s1187_s5 }
  0x13   : > { %p1190_p9 = pnand %p1189_p8, %p1188_p7 }
  0x14   : > { %p1195_p13 = por %p1194_p12, %p1193_p11 }
  0x15   : > { %p1191_p10 = pneg %p1190_p9 }
  0x17   : > { %p1196_p1 = pnand %p1195_p13, %p1191_p10 }
  0x19   : > { %1199 = shalt.err (!%p1196_p1)
}
  0x1a   : > { %s1200_s11 = scalar_lea.vmem %s163_s28, 256  ;;  %s1339_s17 = smov [#allocation5]  }
  0x1b   : > { %p1201_p2 = scmp.ne.s32.totalorder %s163_s28, %s1200_s11  ;;  %s1205_s18 = sshll.u32 %s1339_s17, 4  ;;  %s1206_s18 = int_to_ptr.vmem [resolvable:$false] %s1205_s18 }
  0x1c   : > { %s1207_s20 = scalar_lea.vmem %s1206_s18, 512  ;;  %p1208_p7 = scmp.lt.s32.totalorder %s163_s28, %s1206_s18 }
  0x1d   : > { %p1203_p4 = pnand %p1201_p2, %p1189_p8  ;;  %p1209_p9 = scmp.lt.s32.totalorder %s1207_s20, %s1200_s11 }
  0x1f   : > { %p1204_p5 = pneg %p1203_p4  ;;  %p1210_p3 = por %p1209_p9, %p1208_p7 }
  0x21   : > { %p1211_p0 = pnand %p1210_p3, %p1204_p5 }
  0x23   : > { %1214 = shalt.err (!%p1211_p0)
}
  0x24   : > { %1119 = dma.hbm_to_vmem [thread:$0]  (!%p1419_p6), %s1417_s26, 256, %s163_s28, %s1423_s4  }
  0x25   : > { %s173_s21 = scalar_lea.vmem [#allocation7], %s1086_s30  ;;  %s1447_s23 = sadd.s32 4294967295, %s1337_s15  }
  0x26   : > { %s180_s22 = sshll.u32 %s173_s21, 4  ;;  %s1079_s24 = sadd.s32 4294967294, %s1337_s15   ;;  %s1473_s22 = int_to_ptr.vmem [resolvable:$true] %s180_s22 }
  0x27   : > { %p61_p0 = scmp.ne.s32.totalorder %s1329_s13, %s1325_s12  ;;  %p2241_p3 = scmp.eq.s32.totalorder %s1447_s23, 0 }
  0x28   : > { %p111_p10 = scmp.eq.s32.totalorder %s1447_s23, 1  ;;  %p117_p11 = scmp.eq.s32.totalorder %s1079_s24, 1 }
  0x29   : > { %p1456_p12 = por %p2241_p3, %p61_p0  ;;  %p1080_p13 = scmp.ge.s32.totalorder %s1337_s15, 1 }
  0x2a   : > { %p2256_p1 = scmp.ne.s32.totalorder %s1333_s14, %s1329_s13  ;;  %p1468_p4 = por %p117_p11, %p61_p0 }
  0x2b   : > { %s2255_s25 = scalar_select %p1456_p12, 1, 0 }
  0x2c   : > { %p1464_p2 = por %p111_p10, %p2256_p1  ;;  %p124_p5 = scmp.lt.s32.totalorder %s1337_s15, 3 }
  0x2d   : > { %s2258_s27 = scalar_select %p1468_p4, 1, 0 }
  0x2e   : > { %s2257_s26 = scalar_select %p1464_p2, 1, 0 }
  0x2f   : > { %p1475_p7 = pnand %p1080_p13, %p124_p5  ;;  %s1340_s30 = smov [#allocation2]  }
  0x30   : > { %s136_s5 = sshll.u32 %s1340_s30, 4  ;;  %s1100_s6 = sshll.u32 %s1337_s15, 10  ;;  %s1487_s5 = int_to_ptr.vmem [resolvable:$true] %s136_s5 }
  0x31   : > { %s2259_s28 = scalar_select %p1475_p7, 1, 0 }
  0x32   : > { %p1112_p9 = pneg %p1475_p7  ;;  %s1485_s9 = scalar_lea.hbm %s2238_s2, %s1100_s6 }
  0x33   : > { %s1215_s11 = scalar_lea.hbm %s1485_s9, 1024  ;;  %s1220_s20 = scalar_lea.hbm %s2238_s2, 2048 }
  0x34   : > { %p1491_p0 = pnand %p1112_p9, %p2241_p3  ;;  %p1216_p10 = scmp.ne.s32.totalorder %s1485_s9, %s1215_s11 }
  0x35   : > { %p1221_p1 = scmp.lt.s32.totalorder %s1485_s9, %s2238_s2  ;;  %p1222_p5 = scmp.lt.s32.totalorder %s1220_s20, %s1215_s11 }
  0x36   : > { %p1218_p11 = pnand %p1216_p10, %p1189_p8 }
  0x37   : > { %p1223_p4 = por %p1222_p5, %p1221_p1 }
  0x38   : > { %p1219_p13 = pneg %p1218_p11 }
  0x3a   : > { %p1224_p9 = pnand %p1223_p4, %p1219_p13 }
  0x3c   : > { %1227 = shalt.err (!%p1224_p9)
}
  0x3d   : > { %s1228_s30 = scalar_lea.vmem %s1473_s22, 1024  ;;  %s1341_s6 = smov [#allocation7]  }
  0x3e   : > { %p1229_p3 = scmp.ne.s32.totalorder %s1473_s22, %s1228_s30  ;;  %s1233_s7 = sshll.u32 %s1341_s6, 4  ;;  %s1234_s7 = int_to_ptr.vmem [resolvable:$false] %s1233_s7 }
  0x3f   : > { %s1235_s8 = scalar_lea.vmem %s1234_s7, 2048  ;;  %p1236_p2 = scmp.lt.s32.totalorder %s1473_s22, %s1234_s7 }
  0x40   : > { %p1231_p10 = pnand %p1229_p3, %p1189_p8  ;;  %p1237_p12 = scmp.lt.s32.totalorder %s1235_s8, %s1228_s30 }
  0x42   : > { %p1232_p11 = pneg %p1231_p10  ;;  %p1238_p7 = por %p1237_p12, %p1236_p2 }
  0x44   : > { %p1239_p1 = pnand %p1238_p7, %p1232_p11 }
  0x46   : > { %1242 = shalt.err (!%p1239_p1)
}
  0x47   : > { %s1342_s11 = smov 256   ;;  %s1343_s17 = smov 16  }
  0x48   : > { %1122 = dma.hbm_to_vmem [thread:$0]  (!%p1419_p6), %s1485_s9, 1024, %s1473_s22, %s1423_s4, %s1342_s11, %s1342_s11, %s1343_s17  }
  0x49   : > { %p1245_p8 = pneg %p1491_p0  ;;  %s1254_s18 = scalar_lea.vmem %s1487_s5, 512 }
  0x4a   : > { %p1255_p3 = scmp.ne.s32.totalorder %s1487_s5, %s1254_s18  ;;  %p1262_p2 = scmp.lt.s32.totalorder %s1487_s5, %s1487_s5 }
  0x4b   : > { %p1263_p7 = scmp.lt.s32.totalorder %s1254_s18, %s1254_s18 }
  0x4c   : > { %p1257_p4 = pnand %p1255_p3, %p1245_p8 }
  0x4d   : > { %p1264_p13 = por %p1263_p7, %p1262_p2 }
  0x4e   : > { %p1258_p12 = pneg %p1257_p4 }
  0x50   : > { %p1265_p5 = pnand %p1264_p13, %p1258_p12 }
  0x52   : > { %1268 = shalt.err (!%p1265_p5)
}
  0x53   : > { %1115 = dma.hbm_to_vmem [thread:$0]  (!%p1491_p0), %s2236_s0, 512, %s1487_s5, [#allocation3], %s1342_s11, %s1342_s11, %s1343_s17  }
  0x54   : > { %p2261_p6 = scmp.ne.s32.totalorder %s2259_s28, 0 }
  0x56   : > { %192 = sbr.rel (%p2261_p6) target bundleno = 397 (0x18d), region = 32 }
  0x5b   : > { %p2262_p9 = scmp.eq.s32.totalorder %s1447_s23, 0 }
  0x5d   : > { %1312 = dma.done.wait (%p2262_p9), [#allocation3], 512   ;;  %p2263_p10 = pmov %p2262_p9 }
  0x5e   : > { %s198_s29 = sand.u32 1, %s1447_s23   ;;  %s1538_s4 = sand.u32 1, %s1329_s13  }
  0x5f   : > { %1314 = vsyncadd (%p2263_p10), [#allocation3], 4294966784  ;;  %s1091_s22 = sshll.u32 %s1538_s4, 4  ;;  %s199_s9 = scalar_lea.sflag [#allocation6], %s198_s29 }
  0x60   : > { %s202_s10 = scalar_lea.vmem [#allocation5], %s1091_s22  ;;  %p2264_p0 = scmp.ne.s32.totalorder %s2255_s25, 0 }
  0x62   : > { %1316 = dma.done.wait (%p2264_p0), %s199_s9, 1280  }
  0x63   : > { %1318 = vsyncadd (%p2264_p0), %s199_s9, 4294966016  ;;  %v1545_v0 = vld [vmem:[%s202_s10] sm:$0xff]  ;;  %v1547_v1 = vld [vmem:[%s202_s10 + $0x8] sm:$0xff]  ;;  %s1344_s28 = smov 16   ;;  %s1345_s5 = smov 17   ;;  %vm270_vm0 = vcmask 1043456   ;;  %v263_v18 = vlaneseq }
  0x64   : > { %v1550_v2 = vrot.slane %v1545_v0, 4  ;;  %v1557_v3 = vrot.slane %v1547_v1, 4  ;;  %s1346_s25 = smov 15   ;;  %s1347_s24 = smov 1   ;;  %vm462_vm5 = vcmask 1040384   ;;  %vm465_vm8 = vcmask 1041408  }
  0x65   : > { %s1348_s30 = smov 127   ;;  %s1349_s6 = smov 113   ;;  %v1697_v21 = vand.u32 127, %v263_v18  ;;  %vm468_vm10 = vcmask 1042432   ;;  %vm473_vm12 = vcmask 1044480   ;;  %vm476_vm13 = vcmask 1045504  }
  0x66   : > { %285 = vrot.lane.b32.xlu1 %v1550_v2, %s1344_s28  ;;  %259 = vrot.lane.b32.xlu0 %v1550_v2, %s1345_s5  ;;  %s1092_s7 = sshll.u32 %s1538_s4, 6  ;;  %s1350_s8 = smov 112   ;;  %v355_v12 = vmul.f32 %v1557_v3, %v1547_v1  ;;  %v354_v13 = vmul.f32 %v1550_v2, %v1545_v0  ;;  %vm479_vm14 = vcmask 1046528  }
  0x67   : > { %s1351_s11 = smov 111   ;;  %s211_s17 = scalar_lea.vmem [#allocation7], %s1092_s7  ;;  %vm289_vm1 = vcmp.lt.s32.totalorder %v1697_v21, 16  ;;  %vm265_vm2 = vcmp.lt.s32.totalorder %v1697_v21, 17  ;;  %vm312_vm3 = vcmp.lt.s32.totalorder %v1697_v21, 15  ;;  %vm335_vm4 = vcmp.lt.s32.totalorder %v1697_v21, 1 }
  0x68   : > { %v1590_v4 = vld [vmem:[%s211_s17 + $0x10] sm:$0xff]  ;;  %v1592_v5 = vld [vmem:[%s211_s17] sm:$0xff]  ;;  %v1606_v8 = vld [vmem:[%s211_s17 + $0x18] sm:$0xff]  ;;  %v363_v14 = vsel %vm270_vm0, %v355_v12, 0.0  ;;  %v356_v15 = vsel %vm270_vm0, %v354_v13, 0.0  ;;  %vm374_vm6 = vcmp.lt.s32.totalorder %v1697_v21, 127 }
  0x69   : > { %v1598_v6 = vld [vmem:[%s211_s17 + $0x30] sm:$0xff]  ;;  %v1600_v7 = vld [vmem:[%s211_s17 + $0x20] sm:$0xff]  ;;  %v1608_v9 = vld [vmem:[%s211_s17 + $0x8] sm:$0xff]  ;;  %v364_v16 = vrot.slane %v363_v14, 4  ;;  %v357_v17 = vrot.slane %v356_v15, 4  ;;  %vm397_vm7 = vcmp.lt.s32.totalorder %v1697_v21, 113 }
  0x6a   : > { %287 = vrot.lane.b32.xlu1 %v1557_v3, %s1344_s28  ;;  %261 = vrot.lane.b32.xlu0 %v1557_v3, %s1345_s5  ;;  %2265 = vst [vmem:[#allocation12_spill] sm:$0xff] %v1600_v7  ;;  %v1614_v10 = vld [vmem:[%s211_s17 + $0x38] sm:$0xff]  ;;  %v1616_v11 = vld [vmem:[%s211_s17 + $0x28] sm:$0xff]  ;;  %vm420_vm9 = vcmp.lt.s32.totalorder %v1697_v21, 112  ;;  %vm443_vm11 = vcmp.lt.s32.totalorder %v1697_v21, 111  ;;  %s238_s18 = scalar_lea.vmem [#allocation8], %s1092_s7 }
  0x6b   : > { %2266 = vst [vmem:[#allocation13_spill] sm:$0xff] %v1614_v10  ;;  %2267 = vst [vmem:[#allocation14_spill] sm:$0xff] %v1616_v11  ;;  %v365_v19 = vadd.f32 %v364_v16, %v363_v14  ;;  %v358_v20 = vadd.f32 %v357_v17, %v356_v15  ;;  %s1101_s20 = sshll.u32 %s1447_s23, 10  ;;  %s974_s21 = sshll.u32 %s238_s18, 4  ;;  %s2192_s21 = int_to_ptr.vmem [resolvable:$true] %s974_s21 }
  0x6c   : > { %s2190_s9 = scalar_lea.hbm %s2239_s3, %s1101_s20  ;;  %s961_s23 = scalar_lea.sflag [#allocation4], %s1538_s4 }
  0x6d   : > { %v366_v22 = vrot.slane %v365_v19, 2  ;;  %v359_v23 = vrot.slane %v358_v20, 2  ;;  %s1269_s10 = scalar_lea.vmem %s2192_s21, 1024  ;;  %p2287_p1 = scmp.ne.s32.totalorder %s2257_s26, 0 }
  0x6e   : > { %310 = vrot.lane.b32.xlu1 %v1557_v3, %s1346_s25  ;;  %308 = vrot.lane.b32.xlu0 %v1550_v2, %s1346_s25  ;;  %p1270_p11 = scmp.ne.s32.totalorder %s2192_s21, %s1269_s10 }
  0x6f   : > { %v367_v26 = vadd.f32 %v366_v22, %v365_v19  ;;  %v360_v27 = vadd.f32 %v359_v23, %v358_v20 }
  0x70   : > { %p1271_p8 = pnand %p1270_p11, %p2287_p1 }
  0x71   : > { %v368_v38 = vrot.slane %v367_v26, 1  ;;  %v361_v39 = vrot.slane %v360_v27, 1 }
  0x72   : > { %333 = vrot.lane.b32.xlu1 %v1557_v3, %s1347_s24  ;;  %331 = vrot.lane.b32.xlu0 %v1550_v2, %s1347_s24  ;;  %p1272_p3 = pneg %p1271_p8 }
  0x73   : > { %v1738_v60 = vadd.f32 %v368_v38, %v367_v26  ;;  %v1740_v61 = vadd.f32 %v361_v39, %v360_v27 }
  0x76   : > { %372 = vrot.lane.b32.xlu1 %v1557_v3, %s1348_s30  ;;  %370 = vrot.lane.b32.xlu0 %v1550_v2, %s1348_s30 }
  0x7a   : > { %395 = vrot.lane.b32.xlu1 %v1557_v3, %s1349_s6  ;;  %393 = vrot.lane.b32.xlu0 %v1550_v2, %s1349_s6 }
  0x7e   : > { %418 = vrot.lane.b32.xlu1 %v1557_v3, %s1350_s8  ;;  %416 = vrot.lane.b32.xlu0 %v1550_v2, %s1350_s8 }
  0x82   : > { %441 = vrot.lane.b32.xlu1 %v1557_v3, %s1351_s11  ;;  %439 = vrot.lane.b32.xlu0 %v1550_v2, %s1351_s11 }
  0x86   : > { %536 = vrot.lane.b32.xlu1 %v1590_v4, %s1345_s5  ;;  %534 = vrot.lane.b32.xlu0 %v1592_v5, %s1345_s5 }
  0x8a   : > { %540 = vrot.lane.b32.xlu1 %v1598_v6, %s1345_s5  ;;  %538 = vrot.lane.b32.xlu0 %v1600_v7, %s1345_s5 }
  0x8e   : > { %544 = vrot.lane.b32.xlu1 %v1606_v8, %s1345_s5  ;;  %542 = vrot.lane.b32.xlu0 %v1608_v9, %s1345_s5 }
  0x92   : > { %548 = vrot.lane.b32.xlu1 %v1614_v10, %s1345_s5  ;;  %546 = vrot.lane.b32.xlu0 %v1616_v11, %s1345_s5  ;;  %s1352_s5 = smov [#allocation8]  }
  0x96   : > { %584 = vrot.lane.b32.xlu1 %v1590_v4, %s1344_s28  ;;  %582 = vrot.lane.b32.xlu0 %v1592_v5, %s1344_s28 }
  0x9a   : > { %588 = vrot.lane.b32.xlu1 %v1598_v6, %s1344_s28  ;;  %586 = vrot.lane.b32.xlu0 %v1600_v7, %s1344_s28 }
  0x9e   : > { %592 = vrot.lane.b32.xlu1 %v1606_v8, %s1344_s28  ;;  %590 = vrot.lane.b32.xlu0 %v1608_v9, %s1344_s28 }
  0xa2   : > { %596 = vrot.lane.b32.xlu1 %v1614_v10, %s1344_s28  ;;  %594 = vrot.lane.b32.xlu0 %v1616_v11, %s1344_s28 }
  0xa6   : > { %632 = vrot.lane.b32.xlu1 %v1590_v4, %s1346_s25  ;;  %630 = vrot.lane.b32.xlu0 %v1592_v5, %s1346_s25 }
  0xaa   : > { %636 = vrot.lane.b32.xlu1 %v1598_v6, %s1346_s25  ;;  %634 = vrot.lane.b32.xlu0 %v1600_v7, %s1346_s25 }
  0xae   : > { %640 = vrot.lane.b32.xlu1 %v1606_v8, %s1346_s25  ;;  %638 = vrot.lane.b32.xlu0 %v1608_v9, %s1346_s25 }
  0xb2   : > { %644 = vrot.lane.b32.xlu1 %v1614_v10, %s1346_s25  ;;  %642 = vrot.lane.b32.xlu0 %v1616_v11, %s1346_s25  ;;  %s1273_s25 = sshll.u32 %s1352_s5, 4  ;;  %s1274_s25 = int_to_ptr.vmem [resolvable:$false] %s1273_s25 }
  0xb3   : > { %p1276_p4 = scmp.lt.s32.totalorder %s2192_s21, %s1274_s25 }
  0xb6   : > { %680 = vrot.lane.b32.xlu1 %v1590_v4, %s1347_s24  ;;  %678 = vrot.lane.b32.xlu0 %v1592_v5, %s1347_s24 }
  0xba   : > { %684 = vrot.lane.b32.xlu1 %v1598_v6, %s1347_s24  ;;  %682 = vrot.lane.b32.xlu0 %v1600_v7, %s1347_s24 }
  0xbe   : > { %688 = vrot.lane.b32.xlu1 %v1606_v8, %s1347_s24  ;;  %686 = vrot.lane.b32.xlu0 %v1608_v9, %s1347_s24 }
  0xc2   : > { %692 = vrot.lane.b32.xlu1 %v1614_v10, %s1347_s24  ;;  %690 = vrot.lane.b32.xlu0 %v1616_v11, %s1347_s24  ;;  %s1275_s24 = scalar_lea.vmem %s1274_s25, 2048 }
  0xc3   : > { %p1277_p12 = scmp.lt.s32.totalorder %s1275_s24, %s1269_s10 }
  0xc5   : > { %p1278_p2 = por %p1277_p12, %p1276_p4 }
  0xc6   : > { %752 = vrot.lane.b32.xlu1 %v1590_v4, %s1348_s30  ;;  %750 = vrot.lane.b32.xlu0 %v1592_v5, %s1348_s30 }
  0xc7   : > { %p1279_p7 = pnand %p1278_p2, %p1272_p3 }
  0xca   : > { %756 = vrot.lane.b32.xlu1 %v1598_v6, %s1348_s30  ;;  %754 = vrot.lane.b32.xlu0 %v1600_v7, %s1348_s30 }
  0xce   : > { %760 = vrot.lane.b32.xlu1 %v1606_v8, %s1348_s30  ;;  %758 = vrot.lane.b32.xlu0 %v1608_v9, %s1348_s30 }
  0xd2   : > { %764 = vrot.lane.b32.xlu1 %v1614_v10, %s1348_s30  ;;  %762 = vrot.lane.b32.xlu0 %v1616_v11, %s1348_s30 }
  0xd6   : > { %800 = vrot.lane.b32.xlu1 %v1590_v4, %s1349_s6  ;;  %798 = vrot.lane.b32.xlu0 %v1592_v5, %s1349_s6 }
  0xd8   : > { %v286_v24 = vpop.permute.xlu1 %285  ;;  %v260_v25 = vpop.permute.xlu0 %259 }
  0xda   : > { %804 = vrot.lane.b32.xlu1 %v1598_v6, %s1349_s6  ;;  %802 = vrot.lane.b32.xlu0 %v1600_v7, %s1349_s6 }
  0xdc   : > { %v288_v28 = vpop.permute.xlu1 %287  ;;  %v262_v29 = vpop.permute.xlu0 %261 }
  0xdd   : > { %v290_v30 = vsel %vm289_vm1, %v286_v24, %v288_v28  ;;  %v291_v31 = vsel %vm289_vm1, %v288_v28, %v286_v24  ;;  %v266_v32 = vsel %vm265_vm2, %v260_v25, %v262_v29  ;;  %v267_v33 = vsel %vm265_vm2, %v262_v29, %v260_v25 }
  0xde   : > { %v292_v34 = vmul.f32 %v291_v31, %v1545_v0  ;;  %v293_v35 = vmul.f32 %v290_v30, %v1547_v1  ;;  %v268_v36 = vmul.f32 %v267_v33, %v1545_v0  ;;  %v269_v37 = vmul.f32 %v266_v32, %v1547_v1  ;;  %808 = vrot.lane.b32.xlu1 %v1606_v8, %s1349_s6 }
  0xdf   : > { %806 = vrot.lane.b32.xlu0 %v1608_v9, %s1349_s6 }
  0xe0   : > { %v294_v40 = vsel %vm270_vm0, %v292_v34, 0.0  ;;  %v301_v41 = vsel %vm270_vm0, %v293_v35, 0.0  ;;  %v271_v42 = vsel %vm270_vm0, %v268_v36, 0.0  ;;  %v278_v43 = vsel %vm270_vm0, %v269_v37, 0.0  ;;  %v311_v44 = vpop.permute.xlu1 %310  ;;  %v309_v45 = vpop.permute.xlu0 %308 }
  0xe1   : > { %v295_v46 = vrot.slane %v294_v40, 4  ;;  %v302_v47 = vrot.slane %v301_v41, 4  ;;  %v272_v48 = vrot.slane %v271_v42, 4  ;;  %v279_v49 = vrot.slane %v278_v43, 4 }
  0xe2   : > { %v313_v50 = vsel %vm312_vm3, %v309_v45, %v311_v44  ;;  %v314_v51 = vsel %vm312_vm3, %v311_v44, %v309_v45  ;;  %812 = vrot.lane.b32.xlu1 %v1614_v10, %s1349_s6 }
  0xe3   : > { %v296_v52 = vadd.f32 %v295_v46, %v294_v40  ;;  %v303_v53 = vadd.f32 %v302_v47, %v301_v41  ;;  %v273_v54 = vadd.f32 %v272_v48, %v271_v42  ;;  %v280_v55 = vadd.f32 %v279_v49, %v278_v43  ;;  %810 = vrot.lane.b32.xlu0 %v1616_v11, %s1349_s6 }
  0xe4   : > { %v315_v56 = vmul.f32 %v314_v51, %v1545_v0  ;;  %v316_v57 = vmul.f32 %v313_v50, %v1547_v1  ;;  %v334_v58 = vpop.permute.xlu1 %333  ;;  %v332_v59 = vpop.permute.xlu0 %331 }
  0xe5   : > { %v297_v62 = vrot.slane %v296_v52, 2  ;;  %v304_v63 = vrot.slane %v303_v53, 2  ;;  %v274_v2 = vrot.slane %v273_v54, 2  ;;  %v281_v3 = vrot.slane %v280_v55, 2 }
  0xe6   : > { %v317_v12 = vsel %vm270_vm0, %v315_v56, 0.0  ;;  %v324_v13 = vsel %vm270_vm0, %v316_v57, 0.0  ;;  %v336_v14 = vsel %vm335_vm4, %v332_v59, %v334_v58  ;;  %v337_v15 = vsel %vm335_vm4, %v334_v58, %v332_v59  ;;  %848 = vrot.lane.b32.xlu1 %v1590_v4, %s1350_s8 }
  0xe7   : > { %v298_v16 = vadd.f32 %v297_v62, %v296_v52  ;;  %v305_v17 = vadd.f32 %v304_v63, %v303_v53  ;;  %v275_v19 = vadd.f32 %v274_v2, %v273_v54  ;;  %v282_v20 = vadd.f32 %v281_v3, %v280_v55  ;;  %846 = vrot.lane.b32.xlu0 %v1592_v5, %s1350_s8 }
  0xe8   : > { %v318_v22 = vrot.slane %v317_v12, 4  ;;  %v325_v23 = vrot.slane %v324_v13, 4  ;;  %v338_v24 = vmul.f32 %v337_v15, %v1545_v0  ;;  %v339_v25 = vmul.f32 %v336_v14, %v1547_v1  ;;  %v373_v26 = vpop.permute.xlu1 %372  ;;  %v371_v27 = vpop.permute.xlu0 %370 }
  0xe9   : > { %v299_v28 = vrot.slane %v298_v16, 1  ;;  %v306_v29 = vrot.slane %v305_v17, 1  ;;  %v276_v30 = vrot.slane %v275_v19, 1  ;;  %v283_v31 = vrot.slane %v282_v20, 1 }
  0xea   : > { %v319_v32 = vadd.f32 %v318_v22, %v317_v12  ;;  %v326_v33 = vadd.f32 %v325_v23, %v324_v13  ;;  %v340_v34 = vsel %vm270_vm0, %v338_v24, 0.0  ;;  %v347_v35 = vsel %vm270_vm0, %v339_v25, 0.0  ;;  %852 = vrot.lane.b32.xlu1 %v1598_v6, %s1350_s8 }
  0xeb   : > { %v300_v36 = vadd.f32 %v299_v28, %v298_v16  ;;  %v307_v37 = vadd.f32 %v306_v29, %v305_v17  ;;  %v277_v38 = vadd.f32 %v276_v30, %v275_v19  ;;  %v284_v39 = vadd.f32 %v283_v31, %v282_v20  ;;  %850 = vrot.lane.b32.xlu0 %v1600_v7, %s1350_s8 }
  0xec   : > { %v320_v40 = vrot.slane %v319_v32, 2  ;;  %v327_v41 = vrot.slane %v326_v33, 2  ;;  %v341_v42 = vrot.slane %v340_v34, 4  ;;  %v348_v43 = vrot.slane %v347_v35, 4  ;;  %v396_v44 = vpop.permute.xlu1 %395  ;;  %v394_v45 = vpop.permute.xlu0 %393 }
  0xed   : > { %v463_v46 = vsel %vm462_vm5, %v277_v38, %v300_v36  ;;  %v464_v47 = vsel %vm462_vm5, %v284_v39, %v307_v37  ;;  %v375_v48 = vsel %vm374_vm6, %v371_v27, %v373_v26  ;;  %v376_v49 = vsel %vm374_vm6, %v373_v26, %v371_v27 }
  0xee   : > { %v321_v50 = vadd.f32 %v320_v40, %v319_v32  ;;  %v328_v51 = vadd.f32 %v327_v41, %v326_v33  ;;  %v342_v52 = vadd.f32 %v341_v42, %v340_v34  ;;  %v349_v53 = vadd.f32 %v348_v43, %v347_v35  ;;  %856 = vrot.lane.b32.xlu1 %v1606_v8, %s1350_s8 }
  0xef   : > { %v377_v54 = vmul.f32 %v375_v48, %v1545_v0  ;;  %v378_v55 = vmul.f32 %v376_v49, %v1547_v1  ;;  %v398_v56 = vsel %vm397_vm7, %v394_v45, %v396_v44  ;;  %v399_v57 = vsel %vm397_vm7, %v396_v44, %v394_v45  ;;  %854 = vrot.lane.b32.xlu0 %v1608_v9, %s1350_s8 }
  0xf0   : > { %v322_v58 = vrot.slane %v321_v50, 1  ;;  %v329_v59 = vrot.slane %v328_v51, 1  ;;  %v343_v62 = vrot.slane %v342_v52, 2  ;;  %v350_v63 = vrot.slane %v349_v53, 2  ;;  %v419_v2 = vpop.permute.xlu1 %418  ;;  %v417_v3 = vpop.permute.xlu0 %416 }
  0xf1   : > { %v379_v12 = vsel %vm270_vm0, %v377_v54, 0.0  ;;  %v386_v13 = vsel %vm270_vm0, %v378_v55, 0.0  ;;  %v400_v14 = vmul.f32 %v398_v56, %v1545_v0  ;;  %v401_v15 = vmul.f32 %v399_v57, %v1547_v1 }
  0xf2   : > { %v323_v16 = vadd.f32 %v322_v58, %v321_v50  ;;  %v330_v17 = vadd.f32 %v329_v59, %v328_v51  ;;  %v344_v19 = vadd.f32 %v343_v62, %v342_v52  ;;  %v351_v20 = vadd.f32 %v350_v63, %v349_v53  ;;  %860 = vrot.lane.b32.xlu1 %v1614_v10, %s1350_s8 }
  0xf3   : > { %v380_v22 = vrot.slane %v379_v12, 4  ;;  %v387_v23 = vrot.slane %v386_v13, 4  ;;  %v402_v24 = vsel %vm270_vm0, %v400_v14, 0.0  ;;  %v409_v25 = vsel %vm270_vm0, %v401_v15, 0.0  ;;  %858 = vrot.lane.b32.xlu0 %v1616_v11, %s1350_s8 }
  0xf4   : > { %v466_v26 = vsel %vm465_vm8, %v463_v46, %v323_v16  ;;  %v467_v27 = vsel %vm465_vm8, %v464_v47, %v330_v17  ;;  %v345_v28 = vrot.slane %v344_v19, 1  ;;  %v352_v29 = vrot.slane %v351_v20, 1  ;;  %v442_v30 = vpop.permute.xlu1 %441  ;;  %v440_v31 = vpop.permute.xlu0 %439 }
  0xf5   : > { %v381_v32 = vadd.f32 %v380_v22, %v379_v12  ;;  %v388_v33 = vadd.f32 %v387_v23, %v386_v13  ;;  %v403_v34 = vrot.slane %v402_v24, 4  ;;  %v410_v35 = vrot.slane %v409_v25, 4 }
  0xf6   : > { %v346_v36 = vadd.f32 %v345_v28, %v344_v19  ;;  %v353_v37 = vadd.f32 %v352_v29, %v351_v20  ;;  %v421_v38 = vsel %vm420_vm9, %v417_v3, %v419_v2  ;;  %v422_v39 = vsel %vm420_vm9, %v419_v2, %v417_v3  ;;  %896 = vrot.lane.b32.xlu1 %v1590_v4, %s1351_s11 }
  0xf7   : > { %v382_v40 = vrot.slane %v381_v32, 2  ;;  %v389_v41 = vrot.slane %v388_v33, 2  ;;  %v404_v42 = vadd.f32 %v403_v34, %v402_v24  ;;  %v411_v43 = vadd.f32 %v410_v35, %v409_v25  ;;  %894 = vrot.lane.b32.xlu0 %v1592_v5, %s1351_s11 }
  0xf8   : > { %v469_v44 = vsel %vm468_vm10, %v466_v26, %v346_v36  ;;  %v470_v45 = vsel %vm468_vm10, %v467_v27, %v353_v37  ;;  %v423_v46 = vmul.f32 %v421_v38, %v1545_v0  ;;  %v424_v47 = vmul.f32 %v422_v39, %v1547_v1  ;;  %v537_v48 = vpop.permute.xlu1 %536  ;;  %v535_v49 = vpop.permute.xlu0 %534 }
  0xf9   : > { %v1804_v50 = vsel %vm270_vm0, %v470_v45, %v1738_v60  ;;  %v1808_v51 = vsel %vm270_vm0, %v469_v44, %v1740_v61  ;;  %v405_v52 = vrot.slane %v404_v42, 2  ;;  %v412_v53 = vrot.slane %v411_v43, 2 }
  0xfa   : > { %v425_v54 = vsel %vm270_vm0, %v423_v46, 0.0  ;;  %v432_v55 = vsel %vm270_vm0, %v424_v47, 0.0  ;;  %900 = vrot.lane.b32.xlu1 %v1598_v6, %s1351_s11  ;;  %v383_v56 = vadd.f32 %v382_v40, %v381_v32  ;;  %v390_v57 = vadd.f32 %v389_v41, %v388_v33 }
  0xfb   : > { %v426_v58 = vrot.slane %v425_v54, 4  ;;  %v433_v60 = vrot.slane %v432_v55, 4  ;;  %898 = vrot.lane.b32.xlu0 %v1600_v7, %s1351_s11  ;;  %v406_v61 = vadd.f32 %v405_v52, %v404_v42  ;;  %v413_v59 = vadd.f32 %v412_v53, %v411_v43 }
  0xfc   : > { %v444_v62 = vsel %vm443_vm11, %v440_v31, %v442_v30  ;;  %v445_v63 = vsel %vm443_vm11, %v442_v30, %v440_v31  ;;  %v541_v2 = vpop.permute.xlu1 %540  ;;  %v539_v3 = vpop.permute.xlu0 %538  ;;  %v384_v16 = vrot.slane %v383_v56, 1  ;;  %v391_v17 = vrot.slane %v390_v57, 1 }
  0xfd   : > { %v427_v12 = vadd.f32 %v426_v58, %v425_v54  ;;  %v434_v13 = vadd.f32 %v433_v60, %v432_v55  ;;  %v446_v14 = vmul.f32 %v444_v62, %v1545_v0  ;;  %v447_v15 = vmul.f32 %v445_v63, %v1547_v1 }
  0xfe   : > { %904 = vrot.lane.b32.xlu1 %v1606_v8, %s1351_s11  ;;  %v407_v22 = vrot.slane %v406_v61, 1  ;;  %v414_v23 = vrot.slane %v413_v59, 1  ;;  %v385_v36 = vadd.f32 %v384_v16, %v383_v56  ;;  %v392_v37 = vadd.f32 %v391_v17, %v390_v57 }
  0xff   : > { %v428_v19 = vrot.slane %v427_v12, 2  ;;  %v435_v20 = vrot.slane %v434_v13, 2  ;;  %902 = vrot.lane.b32.xlu0 %v1608_v9, %s1351_s11  ;;  %v448_v24 = vsel %vm270_vm0, %v446_v14, 0.0  ;;  %v455_v25 = vsel %vm270_vm0, %v447_v15, 0.0 }
 0x100   : > { %v545_v26 = vpop.permute.xlu1 %544  ;;  %v543_v0 = vpop.permute.xlu0 %542  ;;  %v449_v28 = vrot.slane %v448_v24, 4  ;;  %v456_v29 = vrot.slane %v455_v25, 4  ;;  %v408_v42 = vadd.f32 %v407_v22, %v406_v61  ;;  %v415_v43 = vadd.f32 %v414_v23, %v413_v59 }
 0x101   : > { %v429_v27 = vadd.f32 %v428_v19, %v427_v12  ;;  %v436_v1 = vadd.f32 %v435_v20, %v434_v13  ;;  %v1831_v30 = vsel %vm265_vm2, %v537_v48, %v545_v26  ;;  %v1835_v31 = vsel %vm265_vm2, %v545_v26, %v537_v48  ;;  %v1875_v12 = vld [vmem:[#allocation2] sm:$0xff]  ;;  %v1877_v13 = vld [vmem:[#allocation2 + $0x8] sm:$0xff] }
 0x102   : > { %908 = vrot.lane.b32.xlu1 %v1614_v10, %s1351_s11  ;;  %v450_v34 = vadd.f32 %v449_v28, %v448_v24  ;;  %v457_v35 = vadd.f32 %v456_v29, %v455_v25  ;;  %v1843_v38 = vsel %vm265_vm2, %v535_v49, %v543_v0  ;;  %v1847_v39 = vsel %vm265_vm2, %v543_v0, %v535_v49 }
 0x103   : > { %v430_v32 = vrot.slane %v429_v27, 1  ;;  %v437_v33 = vrot.slane %v436_v1, 1  ;;  %906 = vrot.lane.b32.xlu0 %v1616_v11, %s1351_s11  ;;  %v474_v58 = vsel %vm473_vm12, %v1808_v51, %v385_v36  ;;  %v475_v60 = vsel %vm473_vm12, %v1804_v50, %v392_v37 }
 0x104   : > { %v549_v40 = vpop.permute.xlu1 %548  ;;  %v547_v41 = vpop.permute.xlu0 %546  ;;  %v451_v44 = vrot.slane %v450_v34, 2  ;;  %v458_v45 = vrot.slane %v457_v35, 2  ;;  %v477_v62 = vsel %vm476_vm13, %v474_v58, %v408_v42  ;;  %v478_v63 = vsel %vm476_vm13, %v475_v60, %v415_v43 }
 0x105   : > { %v1851_v46 = vsel %vm265_vm2, %v541_v2, %v549_v40  ;;  %v1855_v47 = vsel %vm265_vm2, %v549_v40, %v541_v2  ;;  %v1859_v48 = vsel %vm265_vm2, %v539_v3, %v547_v41  ;;  %v1863_v49 = vsel %vm265_vm2, %v547_v41, %v539_v3  ;;  %v1871_v2 = vld [vmem:[#allocation2 + $0x10] sm:$0x1]  ;;  %v1873_v3 = vld [vmem:[#allocation2 + $0x18] sm:$0x1] }
 0x106   : > { %v431_v52 = vadd.f32 %v430_v32, %v429_v27  ;;  %v438_v53 = vadd.f32 %v437_v33, %v436_v1  ;;  %v452_v54 = vadd.f32 %v451_v44, %v450_v34  ;;  %v459_v55 = vadd.f32 %v458_v45, %v457_v35  ;;  %2268 = vst [vmem:[#allocation15_spill] sm:$0xff] %v1871_v2 }
 0x107   : > { %2269 = vst [vmem:[#allocation16_spill] sm:$0xff] %v1873_v3 }
 0x108   : > { %v585_v56 = vpop.permute.xlu1 %584  ;;  %v583_v57 = vpop.permute.xlu0 %582  ;;  %v453_v61 = vrot.slane %v452_v54, 1  ;;  %v460_v59 = vrot.slane %v459_v55, 1  ;;  %v480_v14 = vsel %vm479_vm14, %v477_v62, %v431_v52  ;;  %v481_v15 = vsel %vm479_vm14, %v478_v63, %v438_v53 }
 0x109   : > { %v482_v22 = vmul.f32 %v480_v14, %v1875_v12  ;;  %v483_v23 = vmul.f32 %v481_v15, %v1877_v13 }
 0x10a   : > { %v454_v51 = vadd.f32 %v453_v61, %v452_v54  ;;  %v461_v16 = vadd.f32 %v460_v59, %v459_v55 }
 0x10c   : > { %v589_v17 = vpop.permute.xlu1 %588  ;;  %v587_v50 = vpop.permute.xlu0 %586  ;;  %v484_v19 = vmul.f32 %v454_v51, %v1871_v2  ;;  %v485_v20 = vmul.f32 %v461_v16, %v1873_v3 }
 0x10e   : > { %v486_v24 = vsel %vm462_vm5, %v484_v19, -inf  ;;  %v494_v25 = vsel %vm462_vm5, %v485_v20, -inf }
 0x10f   : > { %v487_v26 = vmax.f32 %v482_v22, %v486_v24  ;;  %v495_v0 = vmax.f32 %v483_v23, %v494_v25 }
 0x110   : > { %v593_v27 = vpop.permute.xlu1 %592  ;;  %v591_v1 = vpop.permute.xlu0 %590 }
 0x111   : > { %v1887_v28 = vsel %vm289_vm1, %v585_v56, %v593_v27  ;;  %v1891_v29 = vsel %vm289_vm1, %v593_v27, %v585_v56  ;;  %v1895_v32 = vsel %vm289_vm1, %v583_v57, %v591_v1  ;;  %v1899_v33 = vsel %vm289_vm1, %v591_v1, %v583_v57 }
 0x112   : > { %v488_v34 = vrot.slane %v487_v26, 4  ;;  %v496_v35 = vrot.slane %v495_v0, 4 }
 0x114   : > { %v489_v36 = vmax.f32 %v487_v26, %v488_v34  ;;  %v497_v37 = vmax.f32 %v495_v0, %v496_v35  ;;  %v597_v40 = vpop.permute.xlu1 %596  ;;  %v595_v41 = vpop.permute.xlu0 %594 }
 0x115   : > { %v1903_v42 = vsel %vm289_vm1, %v589_v17, %v597_v40  ;;  %v1907_v43 = vsel %vm289_vm1, %v597_v40, %v589_v17  ;;  %v1911_v44 = vsel %vm289_vm1, %v587_v50, %v595_v41  ;;  %v1915_v45 = vsel %vm289_vm1, %v595_v41, %v587_v50 }
 0x116   : > { %v490_v52 = vrot.slane %v489_v36, 2  ;;  %v498_v53 = vrot.slane %v497_v37, 2 }
 0x118   : > { %v491_v54 = vmax.f32 %v489_v36, %v490_v52  ;;  %v499_v55 = vmax.f32 %v497_v37, %v498_v53  ;;  %v633_v56 = vpop.permute.xlu1 %632  ;;  %v631_v57 = vpop.permute.xlu0 %630  ;;  %v1954_v52 = vshrl.u32 %v263_v18, 7 }
 0x11a   : > { %v492_v58 = vrot.slane %v491_v54, 1  ;;  %v500_v60 = vrot.slane %v499_v55, 1 }
 0x11c   : > { %v493_v61 = vmax.f32 %v491_v54, %v492_v58  ;;  %v501_v59 = vmax.f32 %v499_v55, %v500_v60  ;;  %v637_v62 = vpop.permute.xlu1 %636  ;;  %v635_v63 = vpop.permute.xlu0 %634  ;;  %v1961_v55 = vsub.s32 0, %v1954_v52 }
 0x11e   : > { %v502_v14 = vsub.f32 %v482_v22, %v493_v61  ;;  %v503_v15 = vsub.f32 %v483_v23, %v501_v59  ;;  %v504_v51 = vsub.f32 %v484_v19, %v493_v61  ;;  %v505_v16 = vsub.f32 %v485_v20, %v501_v59  ;;  %2270 = vst [vmem:[#allocation17_spill] sm:$0xff] %v1961_v55 }
 0x120   : > { %v506_v17 = vmul.f32 1.442695, %v502_v14  ;;  %v508_v24 = vmul.f32 1.442695, %v503_v15  ;;  %v641_v50 = vpop.permute.xlu1 %640  ;;  %v639_v25 = vpop.permute.xlu0 %638  ;;  %v510_v26 = vmul.f32 1.442695, %v504_v51 }
 0x121   : > { %v1919_v0 = vsel %vm312_vm3, %v633_v56, %v641_v50  ;;  %v1923_v27 = vsel %vm312_vm3, %v641_v50, %v633_v56  ;;  %v1927_v1 = vsel %vm312_vm3, %v631_v57, %v639_v25  ;;  %v1931_v19 = vsel %vm312_vm3, %v639_v25, %v631_v57 }
 0x122   : > { %1175 = vpow2.f32 %v506_v17  ;;  %v512_v20 = vmul.f32 1.442695, %v505_v16  ;;  %v608_v56 = vsub.s32 1, %v1954_v52  ;;  %v656_v15 = vsub.s32 2, %v1954_v52 }
 0x123   : > { %1177 = vpow2.f32 %v508_v24 }
 0x124   : > { %v645_v22 = vpop.permute.xlu1 %644  ;;  %v643_v23 = vpop.permute.xlu0 %642  ;;  %1179 = vpow2.f32 %v510_v26 }
 0x125   : > { %v1935_v34 = vsel %vm312_vm3, %v637_v62, %v645_v22  ;;  %v1939_v35 = vsel %vm312_vm3, %v645_v22, %v637_v62  ;;  %v1943_v36 = vsel %vm312_vm3, %v635_v63, %v643_v23  ;;  %v1947_v37 = vsel %vm312_vm3, %v643_v23, %v635_v63 }
 0x126   : > { %1181 = vpow2.f32 %v512_v20 }
 0x128   : > { %v1949_v40 = vpop.permute.xlu1 %680  ;;  %v1951_v41 = vpop.permute.xlu0 %678 }
 0x12c   : > { %v1956_v53 = vpop.permute.xlu1 %684  ;;  %v1958_v54 = vpop.permute.xlu0 %682 }
 0x12f   : > { %v1176_v57 = vpop.eup %1175 }
 0x130   : > { %v1178_v58 = vpop.eup %1177  ;;  %v1965_v60 = vmul.f32 %v1176_v57, %v1875_v12  ;;  %v1967_v61 = vpop.permute.xlu1 %688 }
 0x131   : > { %v1969_v59 = vpop.permute.xlu0 %686  ;;  %v1972_v18 = vmul.f32 %v1178_v58, %v1877_v13  ;;  %v1974_v62 = vpop.eup %1179 }
 0x132   : > { %2271 = vst [vmem:[#allocation18_spill] sm:$0xff] %v1974_v62  ;;  %v561_v63 = vrot.slane %v1965_v60, %v1961_v55  ;;  %v609_v14 = vrot.slane %v1965_v60, %v608_v56  ;;  %v514_v22 = vsel %vm462_vm5, %v1974_v62, 0.0 }
 0x133   : > { %v565_v12 = vrot.slane %v1972_v18, %v1961_v55  ;;  %v613_v51 = vrot.slane %v1972_v18, %v608_v56  ;;  %v1984_v17 = vpop.eup %1181  ;;  %v657_v55 = vrot.slane %v1965_v60, %v656_v15 }
 0x134   : > { %2272 = vst [vmem:[#allocation19_spill] sm:$0xff] %v1984_v17  ;;  %v568_v13 = vmul.f32 %v561_v63, %v1835_v31  ;;  %v566_v24 = vmul.f32 %v561_v63, %v1847_v39  ;;  %v572_v50 = vmul.f32 %v561_v63, %v1855_v47  ;;  %v1989_v25 = vpop.permute.xlu1 %692  ;;  %v570_v31 = vmul.f32 %v561_v63, %v1863_v49 }
 0x135   : > { %v1991_v26 = vpop.permute.xlu0 %690  ;;  %v569_v23 = vmul.f32 %v565_v12, %v1831_v30  ;;  %v567_v56 = vmul.f32 %v565_v12, %v1843_v38  ;;  %v573_v16 = vmul.f32 %v565_v12, %v1851_v46  ;;  %v571_v39 = vmul.f32 %v565_v12, %v1859_v48 }
 0x136   : > { %v616_v47 = vmul.f32 %v609_v14, %v1891_v29  ;;  %v522_v20 = vsel %vm462_vm5, %v1984_v17, 0.0  ;;  %v617_v3 = vmul.f32 %v613_v51, %v1887_v28  ;;  %v614_v62 = vmul.f32 %v609_v14, %v1899_v33 }
 0x137   : > { %v615_v30 = vmul.f32 %v613_v51, %v1895_v32  ;;  %v620_v46 = vmul.f32 %v609_v14, %v1907_v43  ;;  %v621_v49 = vmul.f32 %v613_v51, %v1903_v42  ;;  %v515_v12 = vadd.f32 %v1176_v57, %v514_v22 }
 0x138   : > { %v624_v38 = vadd.f32 %v616_v47, %v568_v13  ;;  %v2010_v63 = vpop.permute.xlu1 %752  ;;  %v625_v2 = vadd.f32 %v617_v3, %v569_v23  ;;  %v622_v17 = vadd.f32 %v614_v62, %v566_v24  ;;  %v523_v28 = vadd.f32 %v1178_v58, %v522_v20 }
 0x139   : > { %v2012_v48 = vpop.permute.xlu0 %750  ;;  %v623_v11 = vadd.f32 %v615_v30, %v567_v56  ;;  %v628_v7 = vadd.f32 %v620_v46, %v572_v50  ;;  %v629_v33 = vadd.f32 %v621_v49, %v573_v16  ;;  %v618_v32 = vmul.f32 %v609_v14, %v1915_v45 }
 0x13a   : > { %v619_v13 = vmul.f32 %v613_v51, %v1911_v44  ;;  %v661_v43 = vrot.slane %v1972_v18, %v656_v15  ;;  %v664_v42 = vmul.f32 %v657_v55, %v1923_v27  ;;  %v824_v47 = vsub.s32 6, %v1954_v52 }
 0x13b   : > { %v626_v10 = vadd.f32 %v618_v32, %v570_v31  ;;  %v662_v29 = vmul.f32 %v657_v55, %v1931_v19  ;;  %v668_v3 = vmul.f32 %v657_v55, %v1939_v35  ;;  %v695_v57 = vsel %vm335_vm4, %v1949_v40, %v1967_v61 }
 0x13c   : > { %v2026_v58 = vpop.permute.xlu1 %756  ;;  %v516_v44 = vrot.slane %v515_v12, 4  ;;  %v627_v62 = vadd.f32 %v619_v13, %v571_v39  ;;  %v665_v27 = vmul.f32 %v661_v43, %v1919_v0  ;;  %v672_v14 = vadd.f32 %v664_v42, %v624_v38 }
 0x13d   : > { %v2028_v45 = vpop.permute.xlu0 %754  ;;  %v524_v15 = vrot.slane %v523_v28, 4  ;;  %v663_v51 = vmul.f32 %v661_v43, %v1927_v1  ;;  %v670_v19 = vadd.f32 %v662_v29, %v622_v17  ;;  %v669_v35 = vmul.f32 %v661_v43, %v1935_v34 }
 0x13e   : > { %v673_v16 = vadd.f32 %v665_v27, %v625_v2  ;;  %v676_v24 = vadd.f32 %v668_v3, %v628_v7  ;;  %v666_v50 = vmul.f32 %v657_v55, %v1947_v37  ;;  %v699_v20 = vsel %vm335_vm4, %v1967_v61, %v1949_v40 }
 0x13f   : > { %v671_v22 = vadd.f32 %v663_v51, %v623_v11  ;;  %v677_v23 = vadd.f32 %v669_v35, %v629_v33  ;;  %v667_v0 = vmul.f32 %v661_v43, %v1943_v36  ;;  %v694_v1 = vsel %vm335_vm4, %v1951_v41, %v1969_v59 }
 0x140   : > { %v761_v17 = vpop.permute.xlu1 %760  ;;  %v2043_v2 = vadd.f32 %v516_v44, %v515_v12  ;;  %v674_v7 = vadd.f32 %v666_v50, %v626_v10  ;;  %v2273_v37 = vsub.s32 3, %v1954_v52  ;;  %v2051_v61 = vadd.f32 %v524_v15, %v523_v28 }
 0x141   : > { %v759_v34 = vpop.permute.xlu0 %758  ;;  %v675_v36 = vadd.f32 %v667_v0, %v627_v62  ;;  %v698_v56 = vsel %vm335_vm4, %v1969_v59, %v1951_v41  ;;  %v697_v10 = vsel %vm335_vm4, %v1956_v53, %v1989_v25  ;;  %v701_v46 = vsel %vm335_vm4, %v1989_v25, %v1956_v53 }
 0x142   : > { %v705_v55 = vrot.slane %v1965_v60, %v2273_v37  ;;  %v2274_v40 = vmov %v2273_v37  ;;  %v696_v41 = vsel %vm335_vm4, %v1958_v54, %v1991_v26  ;;  %v700_v59 = vsel %vm335_vm4, %v1991_v26, %v1958_v54 }
 0x143   : > { %v709_v11 = vrot.slane %v1972_v18, %v2274_v40  ;;  %v2275_v3 = vsub.s32 4, %v1954_v52  ;;  %v767_v54 = vsel %vm374_vm6, %v2010_v63, %v761_v17  ;;  %v771_v26 = vsel %vm374_vm6, %v761_v17, %v2010_v63 }
 0x144   : > { %v712_v31 = vmul.f32 %v705_v55, %v699_v20  ;;  %v710_v30 = vmul.f32 %v705_v55, %v698_v56  ;;  %v765_v29 = vpop.permute.xlu1 %764  ;;  %v716_v43 = vmul.f32 %v705_v55, %v701_v46  ;;  %v714_v53 = vmul.f32 %v705_v55, %v700_v59  ;;  %v2280_v59 = vld [vmem:[#allocation12_spill] sm:$0xff] }
 0x145   : > { %v713_v39 = vmul.f32 %v709_v11, %v695_v57  ;;  %v711_v38 = vmul.f32 %v709_v11, %v694_v1  ;;  %v717_v49 = vmul.f32 %v709_v11, %v697_v10  ;;  %v763_v12 = vpop.permute.xlu0 %762  ;;  %v715_v25 = vmul.f32 %v709_v11, %v696_v41 }
 0x146   : > { %v720_v28 = vadd.f32 %v712_v31, %v672_v14  ;;  %v718_v32 = vadd.f32 %v710_v30, %v670_v19  ;;  %v729_v57 = vrot.slane %v1965_v60, %v2275_v3  ;;  %v2276_v44 = vmov %v2275_v3  ;;  %v2279_v31 = vld [vmem:[#allocation13_spill] sm:$0xff] }
 0x147   : > { %v721_v33 = vadd.f32 %v713_v39, %v673_v16  ;;  %v719_v13 = vadd.f32 %v711_v38, %v671_v22  ;;  %v725_v42 = vadd.f32 %v717_v49, %v677_v23  ;;  %v733_v62 = vrot.slane %v1972_v18, %v2276_v44 }
 0x148   : > { %v724_v27 = vadd.f32 %v716_v43, %v676_v24  ;;  %v722_v14 = vadd.f32 %v714_v53, %v674_v7  ;;  %v723_v15 = vadd.f32 %v715_v25, %v675_v36  ;;  %v2277_v51 = vsub.s32 5, %v1954_v52  ;;  %v801_v35 = vpop.permute.xlu1 %800 }
 0x149   : > { %v799_v16 = vpop.permute.xlu0 %798  ;;  %v736_v50 = vmul.f32 %v729_v57, %v1590_v4  ;;  %v737_v20 = vmul.f32 %v733_v62, %v1606_v8  ;;  %v734_v0 = vmul.f32 %v729_v57, %v1592_v5  ;;  %v735_v24 = vmul.f32 %v733_v62, %v1608_v9 }
 0x14a   : > { %v777_v19 = vrot.slane %v1965_v60, %v2277_v51  ;;  %v2278_v22 = vmov %v2277_v51  ;;  %v766_v1 = vsel %vm374_vm6, %v2012_v48, %v759_v34  ;;  %v770_v17 = vsel %vm374_vm6, %v759_v34, %v2012_v48 }
 0x14b   : > { %v781_v23 = vrot.slane %v1972_v18, %v2278_v22  ;;  %v744_v4 = vadd.f32 %v736_v50, %v720_v28  ;;  %v745_v7 = vadd.f32 %v737_v20, %v721_v33  ;;  %v742_v37 = vadd.f32 %v734_v0, %v718_v32  ;;  %v2281_v33 = vld [vmem:[#allocation14_spill] sm:$0xff] }
 0x14c   : > { %v784_v63 = vmul.f32 %v777_v19, %v767_v54  ;;  %v743_v55 = vadd.f32 %v735_v24, %v719_v13  ;;  %v782_v40 = vmul.f32 %v777_v19, %v766_v1  ;;  %v740_v5 = vmul.f32 %v729_v57, %v1598_v6  ;;  %v805_v36 = vpop.permute.xlu1 %804 }
 0x14d   : > { %v785_v8 = vmul.f32 %v781_v23, %v771_v26  ;;  %v783_v11 = vmul.f32 %v781_v23, %v770_v17  ;;  %v803_v56 = vpop.permute.xlu0 %802  ;;  %v741_v39 = vmul.f32 %v733_v62, %v2279_v31  ;;  %v769_v30 = vsel %vm374_vm6, %v2026_v58, %v765_v29 }
 0x14e   : > { %v792_v9 = vadd.f32 %v784_v63, %v744_v4  ;;  %v790_v48 = vadd.f32 %v782_v40, %v742_v37  ;;  %v748_v38 = vadd.f32 %v740_v5, %v724_v27  ;;  %v773_v46 = vsel %vm374_vm6, %v765_v29, %v2026_v58 }
 0x14f   : > { %v793_v10 = vadd.f32 %v785_v8, %v745_v7  ;;  %v791_v34 = vadd.f32 %v783_v11, %v743_v55  ;;  %v749_v49 = vadd.f32 %v741_v39, %v725_v42  ;;  %v788_v41 = vmul.f32 %v777_v19, %v769_v30 }
 0x150   : > { %v789_v6 = vmul.f32 %v781_v23, %v773_v46  ;;  %v738_v28 = vmul.f32 %v729_v57, %v2280_v59  ;;  %v739_v32 = vmul.f32 %v733_v62, %v2281_v33  ;;  %v768_v13 = vsel %vm374_vm6, %v2028_v45, %v763_v12  ;;  %v809_v53 = vpop.permute.xlu1 %808 }
 0x151   : > { %v772_v43 = vsel %vm374_vm6, %v763_v12, %v2028_v45  ;;  %v825_v58 = vrot.slane %v1965_v60, %v824_v47  ;;  %v796_v29 = vadd.f32 %v788_v41, %v748_v38  ;;  %v786_v3 = vmul.f32 %v777_v19, %v768_v13  ;;  %v807_v57 = vpop.permute.xlu0 %806 }
 0x152   : > { %v797_v42 = vadd.f32 %v789_v6, %v749_v49  ;;  %v746_v25 = vadd.f32 %v738_v28, %v722_v14  ;;  %v747_v44 = vadd.f32 %v739_v32, %v723_v15  ;;  %v787_v62 = vmul.f32 %v781_v23, %v772_v43 }
 0x153   : > { %v815_v54 = vsel %vm397_vm7, %v801_v35, %v809_v53  ;;  %v819_v26 = vsel %vm397_vm7, %v809_v53, %v801_v35  ;;  %v829_v45 = vrot.slane %v1972_v18, %v824_v47  ;;  %v814_v51 = vsel %vm397_vm7, %v799_v16, %v807_v57 }
 0x154   : > { %v794_v27 = vadd.f32 %v786_v3, %v746_v25  ;;  %v832_v12 = vmul.f32 %v825_v58, %v815_v54  ;;  %v518_v14 = vrot.slane %v2043_v2, 2  ;;  %v795_v19 = vadd.f32 %v787_v62, %v747_v44  ;;  %v813_v20 = vpop.permute.xlu1 %812 }
 0x155   : > { %v818_v15 = vsel %vm397_vm7, %v807_v57, %v799_v16  ;;  %v830_v50 = vmul.f32 %v825_v58, %v814_v51  ;;  %v833_v22 = vmul.f32 %v829_v45, %v819_v26  ;;  %v817_v0 = vsel %vm397_vm7, %v805_v36, %v813_v20  ;;  %v811_v63 = vpop.permute.xlu0 %810 }
 0x156   : > { %v840_v23 = vadd.f32 %v832_v12, %v792_v9  ;;  %v831_v35 = vmul.f32 %v829_v45, %v818_v15  ;;  %v821_v24 = vsel %vm397_vm7, %v813_v20, %v805_v36  ;;  %v836_v1 = vmul.f32 %v825_v58, %v817_v0 }
 0x157   : > { %v838_v47 = vadd.f32 %v830_v50, %v790_v48  ;;  %v816_v17 = vsel %vm397_vm7, %v803_v56, %v811_v63  ;;  %v841_v4 = vadd.f32 %v833_v22, %v793_v10  ;;  %v837_v16 = vmul.f32 %v829_v45, %v821_v24 }
 0x158   : > { %v839_v7 = vadd.f32 %v831_v35, %v791_v34  ;;  %v820_v8 = vsel %vm397_vm7, %v811_v63, %v803_v56  ;;  %v526_v37 = vrot.slane %v2051_v61, 2  ;;  %v844_v55 = vadd.f32 %v836_v1, %v796_v29  ;;  %v849_v5 = vpop.permute.xlu1 %848  ;;  %v2283_v35 = vld [vmem:[#allocation18_spill] sm:$0xff]  ;;  %v2284_v63 = vld [vmem:[#allocation16_spill] sm:$0xff] }
 0x159   : > { %v834_v40 = vmul.f32 %v825_v58, %v816_v17  ;;  %v835_v11 = vmul.f32 %v829_v45, %v820_v8  ;;  %v845_v9 = vadd.f32 %v837_v16, %v797_v42  ;;  %v847_v31 = vpop.permute.xlu0 %846  ;;  %v519_v30 = vadd.f32 %v518_v14, %v2043_v2 }
 0x15a   : > { %v527_v48 = vadd.f32 %v526_v37, %v2051_v61  ;;  %v872_v34 = vsub.s32 7, %v1954_v52 }
 0x15b   : > { %v842_v39 = vadd.f32 %v834_v40, %v794_v27  ;;  %v843_v36 = vadd.f32 %v835_v11, %v795_v19  ;;  %v520_v46 = vrot.slane %v519_v30, 1 }
 0x15c   : > { %v853_v10 = vpop.permute.xlu1 %852  ;;  %v528_v56 = vrot.slane %v527_v48, 1  ;;  %v873_v41 = vrot.slane %v1965_v60, %v872_v34  ;;  %v877_v6 = vrot.slane %v1972_v18, %v872_v34 }
 0x15d   : > { %v851_v38 = vpop.permute.xlu0 %850  ;;  %v521_v13 = vadd.f32 %v520_v46, %v519_v30 }
 0x15e   : > { %v529_v53 = vadd.f32 %v528_v56, %v527_v48 }
 0x15f   : > { %1183 = vrcp.f32 %v521_v13 }
 0x160   : > { %v857_v49 = vpop.permute.xlu1 %856  ;;  %1185 = vrcp.f32 %v529_v53 }
 0x161   : > { %v863_v59 = vsel %vm420_vm9, %v849_v5, %v857_v49  ;;  %v867_v28 = vsel %vm420_vm9, %v857_v49, %v849_v5  ;;  %v855_v2 = vpop.permute.xlu0 %854 }
 0x162   : > { %v880_v33 = vmul.f32 %v873_v41, %v863_v59  ;;  %v881_v61 = vmul.f32 %v877_v6, %v867_v28  ;;  %v862_v52 = vsel %vm420_vm9, %v847_v31, %v855_v2  ;;  %v866_v32 = vsel %vm420_vm9, %v855_v2, %v847_v31 }
 0x163   : > { %v878_v43 = vmul.f32 %v873_v41, %v862_v52  ;;  %v879_v60 = vmul.f32 %v877_v6, %v866_v32 }
 0x164   : > { %v888_v18 = vadd.f32 %v880_v33, %v840_v23  ;;  %v889_v58 = vadd.f32 %v881_v61, %v841_v4  ;;  %v861_v29 = vpop.permute.xlu1 %860  ;;  %v2282_v23 = vld [vmem:[#allocation15_spill] sm:$0xff]  ;;  %v2286_v4 = vld [vmem:[#allocation17_spill] sm:$0xff] }
 0x165   : > { %v886_v42 = vadd.f32 %v878_v43, %v838_v47  ;;  %v887_v25 = vadd.f32 %v879_v60, %v839_v7  ;;  %v865_v3 = vsel %vm420_vm9, %v853_v10, %v861_v29  ;;  %v869_v57 = vsel %vm420_vm9, %v861_v29, %v853_v10  ;;  %v859_v44 = vpop.permute.xlu0 %858  ;;  %v2285_v47 = vld [vmem:[#allocation19_spill] sm:$0xff] }
 0x166   : > { %v884_v62 = vmul.f32 %v873_v41, %v865_v3  ;;  %v885_v54 = vmul.f32 %v877_v6, %v869_v57  ;;  %v864_v26 = vsel %vm420_vm9, %v851_v38, %v859_v44  ;;  %v868_v27 = vsel %vm420_vm9, %v859_v44, %v851_v38 }
 0x167   : > { %v882_v45 = vmul.f32 %v873_v41, %v864_v26  ;;  %v883_v12 = vmul.f32 %v877_v6, %v868_v27  ;;  %v532_v0 = vmul.f32 %v2283_v35, %v2282_v23  ;;  %v533_v24 = vmul.f32 %v2285_v47, %v2284_v63 }
 0x168   : > { %v892_v51 = vadd.f32 %v884_v62, %v844_v55  ;;  %v893_v14 = vadd.f32 %v885_v54, %v845_v9  ;;  %v897_v19 = vpop.permute.xlu1 %896 }
 0x169   : > { %v890_v15 = vadd.f32 %v882_v45, %v842_v39  ;;  %v891_v50 = vadd.f32 %v883_v12, %v843_v36  ;;  %v895_v20 = vpop.permute.xlu0 %894  ;;  %v921_v7 = vrot.slane %v532_v0, %v2286_v4  ;;  %v925_v16 = vrot.slane %v533_v24, %v2286_v4 }
 0x16c   : > { %v901_v22 = vpop.permute.xlu1 %900  ;;  %v1184_v36 = vpop.eup %1183 }
 0x16d   : > { %v899_v1 = vpop.permute.xlu0 %898  ;;  %v1186_v34 = vpop.eup %1185 }
 0x170   : > { %v905_v17 = vpop.permute.xlu1 %904 }
 0x171   : > { %v911_v8 = vsel %vm443_vm11, %v897_v19, %v905_v17  ;;  %v915_v37 = vsel %vm443_vm11, %v905_v17, %v897_v19  ;;  %v903_v55 = vpop.permute.xlu0 %902 }
 0x172   : > { %v928_v40 = vmul.f32 %v921_v7, %v911_v8  ;;  %v929_v11 = vmul.f32 %v925_v16, %v915_v37  ;;  %v910_v5 = vsel %vm443_vm11, %v895_v20, %v903_v55  ;;  %v914_v9 = vsel %vm443_vm11, %v903_v55, %v895_v20 }
 0x173   : > { %v926_v31 = vmul.f32 %v921_v7, %v910_v5  ;;  %v927_v39 = vmul.f32 %v925_v16, %v914_v9 }
 0x174   : > { %v936_v30 = vadd.f32 %v928_v40, %v888_v18  ;;  %v937_v48 = vadd.f32 %v929_v11, %v889_v58  ;;  %v909_v10 = vpop.permute.xlu1 %908 }
 0x175   : > { %v934_v38 = vadd.f32 %v926_v31, %v886_v42  ;;  %v935_v46 = vadd.f32 %v927_v39, %v887_v25  ;;  %v913_v56 = vsel %vm443_vm11, %v901_v22, %v909_v10  ;;  %v917_v49 = vsel %vm443_vm11, %v909_v10, %v901_v22  ;;  %v907_v41 = vpop.permute.xlu0 %906 }
 0x176   : > { %v946_v6 = vmul.f32 %v1184_v36, %v936_v30  ;;  %v947_v59 = vmul.f32 %v1186_v34, %v937_v48  ;;  %v932_v28 = vmul.f32 %v921_v7, %v913_v56  ;;  %v933_v2 = vmul.f32 %v925_v16, %v917_v49 }
 0x177   : > { %v944_v33 = vmul.f32 %v1184_v36, %v934_v38  ;;  %v945_v61 = vmul.f32 %v1186_v34, %v935_v46  ;;  %v912_v52 = vsel %vm443_vm11, %v899_v1, %v907_v41  ;;  %v916_v32 = vsel %vm443_vm11, %v907_v41, %v899_v1 }
 0x178   : > { %954 = vst [vmem:[%s238_s18 + $0x10] sm:$0xff] %v946_v6  ;;  %955 = vst [vmem:[%s238_s18 + $0x18] sm:$0xff] %v947_v59  ;;  %v940_v13 = vadd.f32 %v932_v28, %v892_v51  ;;  %v941_v43 = vadd.f32 %v933_v2, %v893_v14  ;;  %v930_v60 = vmul.f32 %v921_v7, %v912_v52 }
 0x179   : > { %v931_v53 = vmul.f32 %v925_v16, %v916_v32  ;;  %952 = vst [vmem:[%s238_s18] sm:$0xff] %v944_v33  ;;  %953 = vst [vmem:[%s238_s18 + $0x8] sm:$0xff] %v945_v61 }
 0x17a   : > { %v950_v18 = vmul.f32 %v1184_v36, %v940_v13  ;;  %v951_v58 = vmul.f32 %v1186_v34, %v941_v43  ;;  %v938_v29 = vadd.f32 %v930_v60, %v890_v15 }
 0x17b   : > { %v939_v42 = vadd.f32 %v931_v53, %v891_v50 }
 0x17c   : > { %958 = vst [vmem:[%s238_s18 + $0x30] sm:$0xff] %v950_v18  ;;  %959 = vst [vmem:[%s238_s18 + $0x38] sm:$0xff] %v951_v58  ;;  %v948_v21 = vmul.f32 %v1184_v36, %v938_v29 }
 0x17d   : > { %v949_v25 = vmul.f32 %v1186_v34, %v939_v42 }
 0x17e   : > { %956 = vst [vmem:[%s238_s18 + $0x20] sm:$0xff] %v948_v21 }
 0x17f   : > { %957 = vst [vmem:[%s238_s18 + $0x28] sm:$0xff] %v949_v25 }
 0x180   : > { %1282 = shalt.err (!%p1279_p7)
}
 0x181   : > { %s1283_s30 = scalar_lea.hbm %s2190_s9, 1024  ;;  %s1287_s8 = scalar_lea.hbm %s2239_s3, 2048 }
 0x182   : > { %p1284_p13 = scmp.ne.s32.totalorder %s2190_s9, %s1283_s30  ;;  %p1288_p9 = scmp.lt.s32.totalorder %s2190_s9, %s2239_s3 }
 0x183   : > { %p1289_p10 = scmp.lt.s32.totalorder %s1287_s8, %s1283_s30 }
 0x184   : > { %p1285_p5 = pnand %p1284_p13, %p2287_p1 }
 0x185   : > { %p1290_p0 = por %p1289_p10, %p1288_p9 }
 0x186   : > { %p1286_p6 = pneg %p1285_p5 }
 0x188   : > { %p1291_p11 = pnand %p1290_p0, %p1286_p6 }
 0x18a   : > { %1294 = shalt.err (!%p1291_p11)
}
 0x18b   : > { %s1353_s18 = smov 256  }
 0x18c   : > { %1110 = dma.vmem_to_hbm [thread:$0]  (%p2287_p1), %s2192_s21, 1024, %s2190_s9, %s961_s23, %s1353_s18, %s1353_s18, %s1344_s28  }
 0x18d PF: > { %s989_s20 = sand.u32 1, %s1325_s12   ;;  %p2288_p8 = scmp.ne.s32.totalorder %s2258_s27, 0 }
 0x18e   : > { %p2289_p3 = scmp.ge.s32.totalorder %s1337_s15, 2  ;;  %s990_s29 = scalar_lea.sflag [#allocation4], %s989_s20 }
 0x190   : > { %p1124_p4 = pnand %p2289_p3, %p2288_p8 }
 0x192   : > { %p1125_p12 = pneg %p1124_p4 }
 0x194   : > { %1320 = dma.done.wait (%p1125_p12), %s990_s29, 1024  }
 0x195   : > { %1322 = vsyncadd (%p1125_p12), %s990_s29, 4294966272  ;;  %p17_p2 = scmp.ge.s32.totalorder %s1395_s16, 4   ;;  %s2290_s12 = smov %s1329_s13 }
 0x196   : > { %s2291_s13 = smov %s1333_s14  ;;  %s2292_s14 = smov %s1406_s19 }
 0x197   : > { %s2293_s15 = smov %s1395_s16  ;;  %19 = sbr.rel (!%p17_p2) target bundleno = 6 (0x6), region = 93 }
 0x19c   :  { %995 = vsyncpa [#allocation3], 1 }
 0x19d   :  { %997 = vsyncpa [#allocation3 + $0x1], 1 }
 0x19e   :  { %998 = vsyncpa [#allocation6], 1 }
 0x19f   :  { %1000 = vsyncpa [#allocation6 + $0x1], 1 }
 0x1a0   :  { %1001 = vsyncpa [#allocation4], 1 }
 0x1a1   :  { %1003 = vsyncpa [#allocation4 + $0x1], 1 }

</bundles_post_ra>
